<compile_context>
chip_gen: v7x
topology: tpu7x:2x2x1
jax: 0.10.0
libtpu: 0.0.40
codegen_flags: <defaults>
</compile_context>

<pallas_src>
import functools

import jax
import jax.numpy as jnp
from jax.experimental import pallas as pl
from jax.experimental.pallas import tpu as pltpu

_LANE = 128


def _round_up(x, m):
    return (x + m - 1) // m * m


def _sublane(dtype):
    # sublane granularity: 8 for 4-byte dtypes, 16 for bf16, 32 for 1-byte.
    return 8 * max(1, 4 // jnp.dtype(dtype).itemsize)


def _choose_tm(rows, tm_max, sub):
    """Row-tile size: a sublane-multiple divisor of `rows` (no padding needed).

    Preference order: >=2 tiles (pipelining + v7x megacore sharding), even
    tile count, then largest tile. Falls back to the full slab (legal
    full-dim block) when rows is not sublane aligned.
    """
    if rows % sub != 0:
        return rows
    hi = max(sub, min(tm_max, rows))
    cands = [tm for tm in range(sub, hi + 1, sub) if rows % tm == 0]

    def rank(tm):
        n = rows // tm
        return (n >= 2, n >= 2 and n % 2 == 0, tm)

    return max(cands, key=rank)


# --------------------------------------------------------------------------
# Kernel: out = sigmoid(logits) @ posmap_t ; padded class columns get -1.0
# --------------------------------------------------------------------------
def _prob_label_kernel(logits_ref, posmap_t_ref, out_ref, *, num_classes, masked):
    # logits_ref : (TM, T)  model dtype   posmap_t_ref : (T, C_pad) model dtype
    # out_ref    : (TM, C_pad) f32
    p = jax.nn.sigmoid(logits_ref[...])   # sigmoid in model dtype (bf16 on v6e/v7x, f32 on v5e)
    acc = jnp.dot(p, posmap_t_ref[...], preferred_element_type=jnp.float32)
    if masked:  # static: fold pad-column sentinel into the accumulator ...
        col = jax.lax.broadcasted_iota(jnp.int32, acc.shape, 1)
        acc = jnp.where(col < num_classes, acc, -1.0)
    out_ref[...] = acc                     # ... single unmasked lane-dense store


def prob_to_label(out_logits, posmap_t, *, num_classes, tm_max=1024):
    """sigmoid(out_logits) @ posmap_t as one Pallas TPU kernel.

    out_logits : [B, Q, T]   model dtype (f32 or bf16 -- no forced cast)
    posmap_t   : [T, C_pad]  prepared (normalized / transposed / zero-padded) map
    returns    : [B*Q, C_pad] f32, with -1.0 sentinel in columns >= num_classes
    """
    B, Q, T = out_logits.shape
    Tm, C_pad = posmap_t.shape
    assert Tm == T, "positive map token dim must match logits token dim"
    rows = B * Q
    dtype = out_logits.dtype
    if posmap_t.dtype != dtype:
        posmap_t = posmap_t.astype(dtype)  # tiny [T, C_pad] cast, only on dtype mismatch

    logits_2d = out_logits.reshape(rows, T)  # contiguous merge: free, no HBM copy
    tm = _choose_tm(rows, tm_max, _sublane(dtype))
    grid = rows // tm

    kernel = functools.partial(
        _prob_label_kernel, num_classes=num_classes, masked=(num_classes != C_pad))

    return pl.pallas_call(
        kernel,
        out_shape=jax.ShapeDtypeStruct((rows, C_pad), jnp.float32),
        grid_spec=pltpu.PrefetchScalarGridSpec(
            num_scalar_prefetch=0,
            grid=(grid,),
            in_specs=[
                pl.BlockSpec((tm, T), lambda i: (i, 0)),
                pl.BlockSpec((T, C_pad), lambda i: (0, 0)),  # resident across row tiles
            ],
            out_specs=pl.BlockSpec((tm, C_pad), lambda i: (i, 0)),
        ),
        compiler_params=pltpu.CompilerParams(
            dimension_semantics=("parallel",)),  # v7x megacore shards the row tiles
    )(logits_2d, posmap_t)


# --------------------------------------------------------------------------
# Hoisted (per prompt set) positive-map preparation
# --------------------------------------------------------------------------
def prepare_positive_map(positive_map, *, dtype=jnp.float32):
    """Row-normalize, transpose, cast and zero-pad the positive map -> [T, C_pad].

    Done ONCE per prompt set (hoisted out of the per-call hot path).
    Zero-sum rows pass through unnormalized (the torch loop skips them).
    """
    positive_map = jnp.asarray(positive_map, jnp.float32)
    C, _ = positive_map.shape
    row_sum = positive_map.sum(axis=1, keepdims=True)
    pos_norm = jnp.where(row_sum != 0,
                         positive_map / jnp.where(row_sum == 0, 1.0, row_sum),
                         positive_map)
    C_pad = _round_up(C, _LANE)
    return jnp.pad(pos_norm.T, ((0, 0), (0, C_pad - C))).astype(dtype)


# --------------------------------------------------------------------------
# Jitted compute core (Pallas kernel + top-k + box transform)
# --------------------------------------------------------------------------
@functools.partial(jax.jit,
                   static_argnames=("num_classes", "num_select", "tm_max", "approx_topk"))
def _post_process_core(out_logits, out_bbox, target_sizes, posmap_t, *,
                       num_classes, num_select, tm_max, approx_topk):
    B, Q, _ = out_logits.shape
    C_pad = posmap_t.shape[1]

    # Pallas kernel: sigmoid + matmul, -1.0 sentinel in padded class columns.
    prob = prob_to_label(out_logits, posmap_t, num_classes=num_classes,
                         tm_max=tm_max)                         # [B*Q, C_pad] f32
    prob_flat = prob.reshape(B, Q * C_pad)                      # free reshape

    # TODO(synk): exact top-k has no clean Pallas TPU primitive; lax.top_k here,
    # with the TPU-native lax.approx_max_k fast path available via approx_topk=True.
    if approx_topk:
        scores, topk_indexes = jax.lax.approx_max_k(prob_flat, num_select)
    else:
        scores, topk_indexes = jax.lax.top_k(prob_flat, num_select)
    topk_boxes = topk_indexes // C_pad                          # query index
    labels = topk_indexes % C_pad                               # class index (< num_classes)

    # Box conversion + per-image scaling only for the K selected boxes (K << Q),
    # plain XLA (the per-element cxcywh->xyxy conversion and scaling commute with
    # the gather, so semantics match the torch reference).
    boxes_sel = jnp.take_along_axis(out_bbox.astype(jnp.float32),
                                    topk_boxes[:, :, None], axis=1)   # [B, K, 4]
    cx, cy, w, h = (boxes_sel[..., 0], boxes_sel[..., 1],
                    boxes_sel[..., 2], boxes_sel[..., 3])
    boxes_xyxy = jnp.stack(
        [cx - 0.5 * w, cy - 0.5 * h, cx + 0.5 * w, cy + 0.5 * h], axis=-1)
    img_h = target_sizes[:, 0].astype(jnp.float32)
    img_w = target_sizes[:, 1].astype(jnp.float32)
    scale_fct = jnp.stack([img_w, img_h, img_w, img_h], axis=1)       # [B, 4]
    boxes = boxes_xyxy * scale_fct[:, None, :]                        # [B, K, 4]
    return scores, labels, boxes


# --------------------------------------------------------------------------
# PostProcess: factory mirrors the torch nn.Module __init__ / forward split
# --------------------------------------------------------------------------
def make_post_process(positive_map, num_select=100, *, approx_topk=False, tm_max=1024):
    positive_map = jnp.asarray(positive_map, jnp.float32)
    num_classes = positive_map.shape[0]
    posmap_t = prepare_positive_map(positive_map)            # hoisted: [T, C_pad]

    def forward(outputs, target_sizes, image_names):
        out_logits = outputs["pred_logits"]                  # [B, Q, T]
        out_bbox = outputs["pred_boxes"]                     # [B, Q, 4]
        assert out_logits.shape[0] == target_sizes.shape[0]
        assert target_sizes.shape[1] == 2
        assert out_logits.shape[2] == posmap_t.shape[0]
        assert num_select <= out_logits.shape[1] * num_classes, \
            "num_select must not exceed queries * classes"

        scores, labels, boxes = _post_process_core(
            out_logits, out_bbox, jnp.asarray(target_sizes), posmap_t,
            num_classes=num_classes, num_select=num_select,
            tm_max=tm_max, approx_topk=approx_topk)

        # Python-list packaging (image names etc.) stays outside the jit boundary.
        return [
            {"scores": s, "labels": l, "boxes": b, "image_names": n, "image_size": i}
            for s, l, b, n, i in zip(scores, labels, boxes, image_names, target_sizes)
        ]

    return forward


# --------------------------------------------------------------------------
# Main: deterministic synthetic example
# --------------------------------------------------------------------------
if __name__ == "__main__":
    key = jax.random.PRNGKey(0)
    B, Q, T, C = 2, 16, 32, 8          # batch, queries, text tokens, categories
    num_select = 10

    k1, k2 = jax.random.split(key)
    pred_logits = jax.random.normal(k1, (B, Q, T), dtype=jnp.float32)
    pred_boxes = jax.nn.sigmoid(jax.random.normal(k2, (B, Q, 4), dtype=jnp.float32))

    # Deterministic synthetic positive map: class c is grounded on tokens {2c, 2c+1}
    # (stands in for create_positive_map(tokenizer(...)) -- no checkpoint/tokenizer).
    cls_ids = jnp.arange(C)[:, None]
    tok_ids = jnp.arange(T)[None, :]
    positive_map = ((tok_ids == 2 * cls_ids) | (tok_ids == 2 * cls_ids + 1)).astype(jnp.float32)

    target_sizes = jnp.array([[480.0, 640.0], [600.0, 800.0]], dtype=jnp.float32)
    image_names = ["img_0.jpg", "img_1.jpg"]

    post_process = make_post_process(positive_map, num_select=num_select)
    outputs = {"pred_logits": pred_logits, "pred_boxes": pred_boxes}
    results = post_process(outputs, target_sizes, image_names)
    for r in results:
        jax.block_until_ready(r["scores"])
        jax.block_until_ready(r["labels"])
        jax.block_until_ready(r["boxes"])

    # --- sanity checks against a pure-JAX reference (safe normalization) ---
    row_sum = positive_map.sum(axis=1, keepdims=True)
    pos_norm = jnp.where(row_sum != 0,
                         positive_map / jnp.where(row_sum == 0, 1.0, row_sum),
                         positive_map)
    prob_ref = jax.nn.sigmoid(pred_logits) @ pos_norm.T                 # [B, Q, C]

    posmap_t = prepare_positive_map(positive_map)                       # [T, C_pad]
    C_pad = posmap_t.shape[1]
    prob_pad = prob_to_label(pred_logits, posmap_t, num_classes=C)      # [B*Q, C_pad]
    assert jnp.all(prob_pad[:, C:] == -1.0), "sentinel missing in padded class columns"
    prob_pallas = prob_pad[:, :C].reshape(B, Q, C)                      # test-only slice
    assert jnp.allclose(prob_ref, prob_pallas, atol=1e-5), "f32 prob mismatch"

    # top-k / labels / boxes equivalence vs. an exact unpadded reference computed
    # on the very same kernel output values.
    vals_ref, idx_ref = jax.lax.top_k(prob_pallas.reshape(B, Q * C), num_select)
    labels_ref = idx_ref % C
    queries_ref = idx_ref // C
    scores_all = jnp.stack([r["scores"] for r in results])
    labels_all = jnp.stack([r["labels"] for r in results])
    boxes_all = jnp.stack([r["boxes"] for r in results])
    assert jnp.allclose(scores_all, vals_ref, atol=1e-6), "top-k score mismatch"
    assert jnp.array_equal(labels_all, labels_ref), "top-k label mismatch"
    assert jnp.all(labels_all < C), "padded class column selected"

    sel = jnp.take_along_axis(pred_boxes, queries_ref[:, :, None], axis=1)
    cxr, cyr, wr, hr = sel[..., 0], sel[..., 1], sel[..., 2], sel[..., 3]
    ref_xyxy = jnp.stack([cxr - 0.5 * wr, cyr - 0.5 * hr,
                          cxr + 0.5 * wr, cyr + 0.5 * hr], axis=-1)
    scale_ref = jnp.stack([target_sizes[:, 1], target_sizes[:, 0],
                           target_sizes[:, 1], target_sizes[:, 0]], axis=1)
    assert jnp.allclose(boxes_all, ref_xyxy * scale_ref[:, None, :], atol=1e-3), "box mismatch"

    assert results[0]["scores"].shape == (num_select,)
    assert results[0]["labels"].shape == (num_select,)
    assert results[0]["boxes"].shape == (num_select, 4)

    # bf16 model-dtype path: sigmoid + MXU operands stay bf16 (v6e/v7x), f32 accumulation.
    prob_bf16 = prob_to_label(pred_logits.astype(jnp.bfloat16), posmap_t, num_classes=C)
    jax.block_until_ready(prob_bf16)
    assert prob_bf16.dtype == jnp.float32
    assert jnp.allclose(prob_ref, prob_bf16[:, :C].reshape(B, Q, C), atol=5e-2), "bf16 prob mismatch"

    # rows % 8 != 0 path: full-slab single block, still no padding copies.
    prob_odd = prob_to_label(pred_logits[:1, :9], posmap_t, num_classes=C)
    jax.block_until_ready(prob_odd)
    assert jnp.allclose(prob_ref[0, :9], prob_odd[:, :C], atol=1e-5), "odd-rows prob mismatch"

    print("KERNEL_OK")
</pallas_src>

<mosaic_0001>
module attributes {stable_mosaic.version = 11 : i64} {
  func.func @_prob_label_kernel(%arg0: i32, %arg1: memref<16x32xf32, #tpu.memory_space<vmem>>, %arg2: memref<32x128xf32, #tpu.memory_space<vmem>>, %arg3: memref<16x128xf32, #tpu.memory_space<vmem>>) attributes {dimension_semantics = [#tpu.dimension_semantics<parallel>], iteration_bounds = array<i64: 2>, scalar_prefetch = 0 : i64, scratch_operands = 0 : i64, tpu.core_type = #tpu.core_type<tc>, window_params = [{transform_indices = @transform_0, window_bounds = array<i64: 16, 32>}, {pipeline_mode = #tpu.pipeline_mode<synchronous>, transform_indices = @transform_1, window_bounds = array<i64: 32, 128>}, {transform_indices = @transform_2, window_bounds = array<i64: 16, 128>}]} {
    %c0 = arith.constant 0 : index
    %c0_0 = arith.constant 0 : index
    %0 = vector.load %arg1[%c0, %c0_0] : memref<16x32xf32, #tpu.memory_space<vmem>>, vector<16x32xf32>
    %1 = arith.negf %0 : vector<16x32xf32>
    %2 = math.exp %1 : vector<16x32xf32>
    %cst = arith.constant 1.000000e+00 : f32
    %3 = vector.broadcast %cst : f32 to vector<16x32xf32>
    %4 = arith.addf %3, %2 : vector<16x32xf32>
    %5 = arith.divf %3, %4 : vector<16x32xf32>
    %c0_1 = arith.constant 0 : index
    %c0_2 = arith.constant 0 : index
    %6 = vector.load %arg2[%c0_1, %c0_2] : memref<32x128xf32, #tpu.memory_space<vmem>>, vector<32x128xf32>
    %cst_3 = arith.constant dense<0.000000e+00> : vector<16x128xf32>
    %7 = tpu.matmul %5, %6, %cst_3 {dimension_numbers = #tpu.dot_dimension_numbers<[1], [0], [0], [1], [0, 0, 1, 1], [], []>} : vector<16x32xf32>, vector<32x128xf32>, vector<16x128xf32> -> vector<16x128xf32>
    %8 = tpu.iota {dimensions = array<i32: 1>} : vector<16x128xi32>
    %c8_i32 = arith.constant 8 : i32
    %9 = vector.broadcast %c8_i32 : i32 to vector<16x128xi32>
    %10 = arith.cmpi slt, %8, %9 : vector<16x128xi32>
    %cst_4 = arith.constant -1.000000e+00 : f32
    %11 = vector.broadcast %cst_4 : f32 to vector<16x128xf32>
    %12 = arith.select %10, %7, %11 : vector<16x128xi1>, vector<16x128xf32>
    %c0_5 = arith.constant 0 : index
    %c0_6 = arith.constant 0 : index
    %13 = vector.load %arg3[%c0_5, %c0_6] : memref<16x128xf32, #tpu.memory_space<vmem>>, vector<16x128xf32>
    tpu.vector_store %arg3[%c0_5, %c0_6], %12 {strides = array<i32>} : memref<16x128xf32, #tpu.memory_space<vmem>>, vector<16x128xf32>,
    return
  }
  func.func @transform_0(%arg0: i32) -> (i32, i32) {
    %c0_i32 = arith.constant 0 : i32
    %c0_i32_0 = arith.constant 0 : i32
    return %arg0, %c0_i32 : i32, i32
  }
  func.func @transform_1(%arg0: i32) -> (i32, i32) {
    %c0_i32 = arith.constant 0 : i32
    %c0_i32_0 = arith.constant 0 : i32
    %c0_i32_1 = arith.constant 0 : i32
    return %c0_i32, %c0_i32_0 : i32, i32
  }
  func.func @transform_2(%arg0: i32) -> (i32, i32) {
    %c0_i32 = arith.constant 0 : i32
    %c0_i32_0 = arith.constant 0 : i32
    return %arg0, %c0_i32 : i32, i32
  }
}

</mosaic_0001>

<bundles_post_ra>
// kernel: custom-call
= control target key start
LH: loop header
LB: loop body
LE: loop exit
PB: predicated region body
PF: predicated region fallthrough
CT: control target
= control target key end

     0   :  { %5 = vsyncpa [#allocation9], 0  ;;  %v1586_v0 = vmov 2147483648   ;;  %v1587_v1 = vmov 2147483647   ;;  %s1867_s0 = inlined_call_operand.vmem [shape: f32[2,2048], index: 0, kind: input, shape index: {}]   ;;  %s1868_s1 = inlined_call_operand.hbm [shape: f32[2,10], index: 1, kind: output, shape index: {0}]   ;;  %s1869_s2 = inlined_call_operand.vmem [shape: s32[2,10], index: 2, kind: output, shape index: {1}]  }
   0x1   :  { %7 = vst [vmem:[#allocation12] sm:$0xff] %v1586_v0  ;;  %9 = vst [vmem:[#allocation12 + $0x8] sm:$0xff] %v1586_v0 }
   0x2   :  { %10 = vst [vmem:[#allocation14] sm:$0xff] %v1587_v1  ;;  %12 = vst [vmem:[#allocation14 + $0x8] sm:$0xff] %v1587_v1 }
   0x3   :  { %v42_v2 = vlaneseq  ;;  %v29_v3 = vld [vmem:[%s1867_s0] sm:$0xff]  ;;  %v1588_v4 = vmov 2147483648   ;;  %v1589_v5 = vmov 2147483647   ;;  %v31_v6 = vld [vmem:[%s1867_s0 + $0x8] sm:$0xff]  ;;  %v33_v7 = vld [vmem:[%s1867_s0 + $0x10] sm:$0xff] }
   0x4   :  { %107 = vst [vmem:[#allocation13] sm:$0xff] %v1588_v4  ;;  %109 = vst [vmem:[#allocation13 + $0x8] sm:$0xff] %v1588_v4  ;;  %v35_v8 = vld [vmem:[%s1867_s0 + $0x18] sm:$0xff]  ;;  %vm52_vm0 = vcmp.lt.s32.totalorder %v29_v3, 0  ;;  %v53_v12 = vsub.s32 2147483647, %v29_v3 }
   0x5   :  { %110 = vst [vmem:[#allocation15] sm:$0xff] %v1589_v5  ;;  %112 = vst [vmem:[#allocation15 + $0x8] sm:$0xff] %v1589_v5  ;;  %v1624_v9 = vshrl.u32 %v42_v2, 7  ;;  %v43_v10 = vand.u32 127, %v42_v2  ;;  %v62_v13 = vsub.s32 2147483647, %v31_v6 }
   0x6   :  { %v71_v14 = vsub.s32 2147483647, %v33_v7  ;;  %v80_v15 = vsub.s32 2147483647, %v35_v8  ;;  %vm61_vm1 = vcmp.lt.s32.totalorder %v31_v6, 0  ;;  %vm70_vm2 = vcmp.lt.s32.totalorder %v33_v7, 0 }
   0x7   :  { %v46_v11 = vshrl.u32 %v1624_v9, 1  ;;  %vm79_vm3 = vcmp.lt.s32.totalorder %v35_v8, 0  ;;  %v54_v18 = vsel %vm52_vm0, %v53_v12, %v29_v3  ;;  %v63_v19 = vsel %vm61_vm1, %v62_v13, %v31_v6  ;;  %s1628_s0 = smov 0  }
   0x8   :  { %v72_v20 = vsel %vm70_vm2, %v71_v14, %v33_v7  ;;  %v81_v21 = vsel %vm79_vm3, %v80_v15, %v35_v8 }
   0x9   :  { %v48_v16 = vmul.u32 128, %v46_v11 }
   0xb   :  { %v49_v17 = vadd.s32 %v48_v16, %v43_v10 }
   0xd   :  { %vm56_vm4 = vcmp.lt.s32.totalorder %v49_v17, 2048  ;;  %v64_v22 = vadd.s32 512, %v49_v17  ;;  %v73_v23 = vadd.s32 1024, %v49_v17  ;;  %v82_v24 = vadd.s32 1536, %v49_v17  ;;  %96 = vst [vmem:[#allocation17] sm:$0xff] %v49_v17 }
   0xe   :  { %v57_v25 = vsel %vm56_vm4, %v54_v18, 2147483648 }
   0xf   :  { %58 = vst [vmem:[#allocation16] sm:$0xff] %v57_v25  ;;  %vm65_vm5 = vcmp.lt.s32.totalorder %v64_v22, 2048  ;;  %vm74_vm6 = vcmp.lt.s32.totalorder %v73_v23, 2048  ;;  %vm83_vm7 = vcmp.lt.s32.totalorder %v82_v24, 2048  ;;  %99 = vst [vmem:[#allocation17 + $0x8] sm:$0xff] %v64_v22 }
  0x10   :  { %102 = vst [vmem:[#allocation17 + $0x10] sm:$0xff] %v73_v23  ;;  %105 = vst [vmem:[#allocation17 + $0x18] sm:$0xff] %v82_v24  ;;  %v66_v26 = vsel %vm65_vm5, %v63_v19, 2147483648  ;;  %v75_v27 = vsel %vm74_vm6, %v72_v20, 2147483648  ;;  %v84_v28 = vsel %vm83_vm7, %v81_v21, 2147483648 }
  0x11   :  { %67 = vst [vmem:[#allocation16 + $0x8] sm:$0xff] %v66_v26  ;;  %76 = vst [vmem:[#allocation16 + $0x10] sm:$0xff] %v75_v27 }
  0x12   :  { %85 = vst [vmem:[#allocation16 + $0x18] sm:$0xff] %v84_v28 }
  0x13 LB: > { %s472_s17 = scalar_lea.vmem [#allocation13], %s1584_s0  ;;  %s474_s18 = scalar_lea.vmem [#allocation15], %s1584_s0  ;;  %s1584_s0 = sphi %s1628_s0, %s119_s0  }
  0x14   : > { %v121_v30 = vld [vmem:[#allocation17] sm:$0xff]  ;;  %s119_s0 = sadd.s32 1, %s1584_s0  }
  0x15   : > { %p116_p2 = scmp.ge.s32.totalorder %s119_s0, 10  }
  0x16   : > { %v120_v29 = vld [vmem:[#allocation16] sm:$0xff]  ;;  %v126_v32 = vld [vmem:[#allocation17 + $0x8] sm:$0xff]  ;;  %s1595_s0 = smov (%p116_p2), [#allocation8]  }
  0x17   : > { %vm130_vm10 = vcmp.lt.s32.totalorder %v126_v32, %v121_v30  ;;  %v139_v34 = vld [vmem:[#allocation17 + $0x10] sm:$0xff]  ;;  %v152_v38 = vld [vmem:[#allocation17 + $0x18] sm:$0xff] }
  0x18   : > { %v124_v31 = vld [vmem:[#allocation16 + $0x8] sm:$0xff]  ;;  %v137_v33 = vld [vmem:[#allocation16 + $0x10] sm:$0xff] }
  0x19   : > { %vm128_vm8 = vcmp.gt.s32.totalorder %v124_v31, %v120_v29  ;;  %vm129_vm9 = vcmp.eq.s32.totalorder %v124_v31, %v120_v29  ;;  %v150_v37 = vld [vmem:[#allocation16 + $0x18] sm:$0xff] }
  0x1a   : > { %vm131_vm11 = vmand %vm129_vm9, %vm130_vm10 }
  0x1b   : > { %vm132_vm12 = vmor %vm128_vm8, %vm131_vm11 }
  0x1c   : > { %v133_v35 = vsel %vm132_vm12, %v124_v31, %v120_v29  ;;  %v134_v36 = vsel %vm132_vm12, %v126_v32, %v121_v30 }
  0x1d   : > { %vm141_vm13 = vcmp.gt.s32.totalorder %v137_v33, %v133_v35  ;;  %vm142_vm14 = vcmp.eq.s32.totalorder %v137_v33, %v133_v35  ;;  %vm143_vm15 = vcmp.lt.s32.totalorder %v139_v34, %v134_v36 }
  0x1e   : > { %vm144_vm0 = vmand %vm142_vm14, %vm143_vm15 }
  0x1f   : > { %vm145_vm1 = vmor %vm141_vm13, %vm144_vm0 }
  0x20   : > { %v146_v39 = vsel %vm145_vm1, %v137_v33, %v133_v35  ;;  %v147_v40 = vsel %vm145_vm1, %v139_v34, %v134_v36 }
  0x21   : > { %vm154_vm2 = vcmp.gt.s32.totalorder %v150_v37, %v146_v39  ;;  %vm155_vm3 = vcmp.eq.s32.totalorder %v150_v37, %v146_v39  ;;  %vm156_vm4 = vcmp.lt.s32.totalorder %v152_v38, %v147_v40 }
  0x22   : > { %vm157_vm5 = vmand %vm155_vm3, %vm156_vm4 }
  0x23   : > { %vm158_vm6 = vmor %vm154_vm2, %vm157_vm5 }
  0x24   : > { %v159_v41 = vsel %vm158_vm6, %v150_v37, %v146_v39  ;;  %v160_v42 = vsel %vm158_vm6, %v152_v38, %v147_v40 }
  0x25   : > { %v162_v43 = vrot.slane %v159_v41, 2  ;;  %v163_v44 = vrot.slane %v160_v42, 2 }
  0x27   : > { %vm165_vm7 = vcmp.gt.s32.totalorder %v162_v43, %v159_v41  ;;  %vm166_vm8 = vcmp.eq.s32.totalorder %v162_v43, %v159_v41  ;;  %vm167_vm9 = vcmp.lt.s32.totalorder %v163_v44, %v160_v42 }
  0x28   : > { %vm168_vm10 = vmand %vm166_vm8, %vm167_vm9 }
  0x29   : > { %vm169_vm11 = vmor %vm165_vm7, %vm168_vm10 }
  0x2a   : > { %v170_v45 = vsel %vm169_vm11, %v162_v43, %v159_v41  ;;  %v171_v46 = vsel %vm169_vm11, %v163_v44, %v160_v42 }
  0x2b   : > { %v173_v47 = vrot.slane %v170_v45, 2  ;;  %v174_v48 = vrot.slane %v171_v46, 2 }
  0x2d   : > { %vm176_vm12 = vcmp.gt.s32.totalorder %v173_v47, %v170_v45  ;;  %vm177_vm13 = vcmp.eq.s32.totalorder %v173_v47, %v170_v45  ;;  %vm178_vm14 = vcmp.lt.s32.totalorder %v174_v48, %v171_v46 }
  0x2e   : > { %vm179_vm15 = vmand %vm177_vm13, %vm178_vm14 }
  0x2f   : > { %vm180_vm0 = vmor %vm176_vm12, %vm179_vm15 }
  0x30   : > { %v181_v49 = vsel %vm180_vm0, %v173_v47, %v170_v45  ;;  %v182_v50 = vsel %vm180_vm0, %v174_v48, %v171_v46 }
  0x31   : > { %v184_v51 = vrot.slane %v181_v49, 2  ;;  %v185_v52 = vrot.slane %v182_v50, 2 }
  0x33   : > { %vm187_vm1 = vcmp.gt.s32.totalorder %v184_v51, %v181_v49  ;;  %vm188_vm2 = vcmp.eq.s32.totalorder %v184_v51, %v181_v49  ;;  %vm189_vm3 = vcmp.lt.s32.totalorder %v185_v52, %v182_v50 }
  0x34   : > { %vm190_vm4 = vmand %vm188_vm2, %vm189_vm3 }
  0x35   : > { %vm191_vm5 = vmor %vm187_vm1, %vm190_vm4 }
  0x36   : > { %v193_v53 = vsel %vm191_vm5, %v185_v52, %v182_v50  ;;  %v192_v54 = vsel %vm191_vm5, %v184_v51, %v181_v49 }
  0x37   : > { %227 = vxpose.xlu1.b32.start [1/16] %v193_v53, 128  ;;  %195 = vxpose.xlu0.b32.start [1/16] %v192_v54, 128 }
  0x3b   : > { %228 = vxpose.xlu1.b32.cont [2/16] %v193_v53, 128  ;;  %196 = vxpose.xlu0.b32.cont [2/16] %v192_v54, 128 }
  0x3f   : > { %229 = vxpose.xlu1.b32.cont [3/16] %v193_v53, 128  ;;  %197 = vxpose.xlu0.b32.cont [3/16] %v192_v54, 128 }
  0x43   : > { %230 = vxpose.xlu1.b32.cont [4/16] %v193_v53, 128  ;;  %198 = vxpose.xlu0.b32.cont [4/16] %v192_v54, 128 }
  0x47   : > { %231 = vxpose.xlu1.b32.cont [5/16] %v193_v53, 128  ;;  %199 = vxpose.xlu0.b32.cont [5/16] %v192_v54, 128 }
  0x4b   : > { %232 = vxpose.xlu1.b32.cont [6/16] %v193_v53, 128  ;;  %200 = vxpose.xlu0.b32.cont [6/16] %v192_v54, 128 }
  0x4f   : > { %233 = vxpose.xlu1.b32.cont [7/16] %v193_v53, 128  ;;  %201 = vxpose.xlu0.b32.cont [7/16] %v192_v54, 128 }
  0x53   : > { %234 = vxpose.xlu1.b32.cont [8/16] %v193_v53, 128  ;;  %202 = vxpose.xlu0.b32.cont [8/16] %v192_v54, 128 }
  0x57   : > { %235 = vxpose.xlu1.b32.cont [9/16] %v193_v53, 128  ;;  %203 = vxpose.xlu0.b32.cont [9/16] %v192_v54, 128 }
  0x5b   : > { %236 = vxpose.xlu1.b32.cont [10/16] %v193_v53, 128  ;;  %204 = vxpose.xlu0.b32.cont [10/16] %v192_v54, 128 }
  0x5f   : > { %237 = vxpose.xlu1.b32.cont [11/16] %v193_v53, 128  ;;  %205 = vxpose.xlu0.b32.cont [11/16] %v192_v54, 128 }
  0x63   : > { %238 = vxpose.xlu1.b32.cont [12/16] %v193_v53, 128  ;;  %206 = vxpose.xlu0.b32.cont [12/16] %v192_v54, 128 }
  0x67   : > { %239 = vxpose.xlu1.b32.cont [13/16] %v193_v53, 128  ;;  %207 = vxpose.xlu0.b32.cont [13/16] %v192_v54, 128 }
  0x6b   : > { %240 = vxpose.xlu1.b32.cont [14/16] %v193_v53, 128  ;;  %208 = vxpose.xlu0.b32.cont [14/16] %v192_v54, 128 }
  0x6f   : > { %241 = vxpose.xlu1.b32.cont [15/16] %v193_v53, 128  ;;  %209 = vxpose.xlu0.b32.cont [15/16] %v192_v54, 128 }
  0x73   : > { %242 = vxpose.xlu1.b32.end [16/16] %v193_v53, 128  ;;  %210 = vxpose.xlu0.b32.end [16/16] %v192_v54, 128 }
  0xb7   : > { %v243_v55 = vpop.trf.xlu1  ;;  %v211_v56 = vpop.trf.xlu0 }
  0xbb   : > { %v244_v57 = vpop.trf.xlu1  ;;  %v212_v58 = vpop.trf.xlu0 }
  0xbc   : > { %vm263_vm6 = vcmp.lt.s32.totalorder %v244_v57, %v243_v55  ;;  %vm261_vm7 = vcmp.gt.s32.totalorder %v212_v58, %v211_v56  ;;  %vm262_vm8 = vcmp.eq.s32.totalorder %v212_v58, %v211_v56 }
  0xbd   : > { %vm264_vm9 = vmand %vm262_vm8, %vm263_vm6 }
  0xbe   : > { %vm265_vm10 = vmor %vm261_vm7, %vm264_vm9 }
  0xbf   : > { %v266_v59 = vsel %vm265_vm10, %v212_v58, %v211_v56  ;;  %v245_v60 = vpop.trf.xlu1  ;;  %v267_v61 = vsel %vm265_vm10, %v244_v57, %v243_v55  ;;  %v213_v62 = vpop.trf.xlu0 }
  0xc0   : > { %vm272_vm11 = vcmp.lt.s32.totalorder %v245_v60, %v267_v61  ;;  %vm270_vm12 = vcmp.gt.s32.totalorder %v213_v62, %v266_v59  ;;  %vm271_vm13 = vcmp.eq.s32.totalorder %v213_v62, %v266_v59 }
  0xc1   : > { %vm273_vm14 = vmand %vm271_vm13, %vm272_vm11 }
  0xc2   : > { %vm274_vm15 = vmor %vm270_vm12, %vm273_vm14 }
  0xc3   : > { %v275_v63 = vsel %vm274_vm15, %v213_v62, %v266_v59  ;;  %v246_v0 = vpop.trf.xlu1  ;;  %v276_v1 = vsel %vm274_vm15, %v245_v60, %v267_v61  ;;  %v214_v3 = vpop.trf.xlu0 }
  0xc4   : > { %vm281_vm0 = vcmp.lt.s32.totalorder %v246_v0, %v276_v1  ;;  %vm279_vm1 = vcmp.gt.s32.totalorder %v214_v3, %v275_v63  ;;  %vm280_vm2 = vcmp.eq.s32.totalorder %v214_v3, %v275_v63 }
  0xc5   : > { %vm282_vm3 = vmand %vm280_vm2, %vm281_vm0 }
  0xc6   : > { %vm283_vm4 = vmor %vm279_vm1, %vm282_vm3 }
  0xc7   : > { %v284_v4 = vsel %vm283_vm4, %v214_v3, %v275_v63  ;;  %v247_v5 = vpop.trf.xlu1  ;;  %v285_v6 = vsel %vm283_vm4, %v246_v0, %v276_v1  ;;  %v215_v7 = vpop.trf.xlu0 }
  0xc8   : > { %vm290_vm5 = vcmp.lt.s32.totalorder %v247_v5, %v285_v6  ;;  %vm288_vm6 = vcmp.gt.s32.totalorder %v215_v7, %v284_v4  ;;  %vm289_vm7 = vcmp.eq.s32.totalorder %v215_v7, %v284_v4 }
  0xc9   : > { %vm291_vm8 = vmand %vm289_vm7, %vm290_vm5 }
  0xca   : > { %vm292_vm9 = vmor %vm288_vm6, %vm291_vm8 }
  0xcb   : > { %v293_v8 = vsel %vm292_vm9, %v215_v7, %v284_v4  ;;  %v248_v10 = vpop.trf.xlu1  ;;  %v294_v11 = vsel %vm292_vm9, %v247_v5, %v285_v6  ;;  %v216_v12 = vpop.trf.xlu0 }
  0xcc   : > { %vm299_vm10 = vcmp.lt.s32.totalorder %v248_v10, %v294_v11  ;;  %vm297_vm11 = vcmp.gt.s32.totalorder %v216_v12, %v293_v8  ;;  %vm298_vm12 = vcmp.eq.s32.totalorder %v216_v12, %v293_v8 }
  0xcd   : > { %vm300_vm13 = vmand %vm298_vm12, %vm299_vm10 }
  0xce   : > { %vm301_vm14 = vmor %vm297_vm11, %vm300_vm13 }
  0xcf   : > { %v302_v13 = vsel %vm301_vm14, %v216_v12, %v293_v8  ;;  %v249_v14 = vpop.trf.xlu1  ;;  %v303_v15 = vsel %vm301_vm14, %v248_v10, %v294_v11  ;;  %v217_v16 = vpop.trf.xlu0 }
  0xd0   : > { %vm308_vm15 = vcmp.lt.s32.totalorder %v249_v14, %v303_v15  ;;  %vm306_vm0 = vcmp.gt.s32.totalorder %v217_v16, %v302_v13  ;;  %vm307_vm1 = vcmp.eq.s32.totalorder %v217_v16, %v302_v13 }
  0xd1   : > { %vm309_vm2 = vmand %vm307_vm1, %vm308_vm15 }
  0xd2   : > { %vm310_vm3 = vmor %vm306_vm0, %vm309_vm2 }
  0xd3   : > { %v311_v17 = vsel %vm310_vm3, %v217_v16, %v302_v13  ;;  %v250_v18 = vpop.trf.xlu1  ;;  %v312_v19 = vsel %vm310_vm3, %v249_v14, %v303_v15  ;;  %v218_v20 = vpop.trf.xlu0 }
  0xd4   : > { %vm317_vm4 = vcmp.lt.s32.totalorder %v250_v18, %v312_v19  ;;  %vm315_vm5 = vcmp.gt.s32.totalorder %v218_v20, %v311_v17  ;;  %vm316_vm6 = vcmp.eq.s32.totalorder %v218_v20, %v311_v17 }
  0xd5   : > { %vm318_vm7 = vmand %vm316_vm6, %vm317_vm4 }
  0xd6   : > { %vm319_vm8 = vmor %vm315_vm5, %vm318_vm7 }
  0xd7   : > { %v320_v21 = vsel %vm319_vm8, %v218_v20, %v311_v17  ;;  %v251_v22 = vpop.trf.xlu1  ;;  %v321_v23 = vsel %vm319_vm8, %v250_v18, %v312_v19  ;;  %v219_v24 = vpop.trf.xlu0 }
  0xd8   : > { %vm326_vm9 = vcmp.lt.s32.totalorder %v251_v22, %v321_v23  ;;  %vm324_vm10 = vcmp.gt.s32.totalorder %v219_v24, %v320_v21  ;;  %vm325_vm11 = vcmp.eq.s32.totalorder %v219_v24, %v320_v21 }
  0xd9   : > { %vm327_vm12 = vmand %vm325_vm11, %vm326_vm9 }
  0xda   : > { %vm328_vm13 = vmor %vm324_vm10, %vm327_vm12 }
  0xdb   : > { %v329_v25 = vsel %vm328_vm13, %v219_v24, %v320_v21  ;;  %v252_v26 = vpop.trf.xlu1  ;;  %v330_v27 = vsel %vm328_vm13, %v251_v22, %v321_v23  ;;  %v220_v28 = vpop.trf.xlu0  ;;  %v1590_v24 = vmov 2147483648  }
  0xdc   : > { %vm335_vm14 = vcmp.lt.s32.totalorder %v252_v26, %v330_v27  ;;  %vm333_vm15 = vcmp.gt.s32.totalorder %v220_v28, %v329_v25  ;;  %vm334_vm0 = vcmp.eq.s32.totalorder %v220_v28, %v329_v25 }
  0xdd   : > { %vm336_vm1 = vmand %vm334_vm0, %vm335_vm14 }
  0xde   : > { %vm337_vm2 = vmor %vm333_vm15, %vm336_vm1 }
  0xdf   : > { %v338_v29 = vsel %vm337_vm2, %v220_v28, %v329_v25  ;;  %v253_v30 = vpop.trf.xlu1  ;;  %v339_v31 = vsel %vm337_vm2, %v252_v26, %v330_v27  ;;  %v221_v32 = vpop.trf.xlu0  ;;  %v1591_v25 = vmov 2147483647  }
  0xe0   : > { %vm344_vm3 = vcmp.lt.s32.totalorder %v253_v30, %v339_v31  ;;  %vm342_vm4 = vcmp.gt.s32.totalorder %v221_v32, %v338_v29  ;;  %vm343_vm5 = vcmp.eq.s32.totalorder %v221_v32, %v338_v29 }
  0xe1   : > { %vm345_vm6 = vmand %vm343_vm5, %vm344_vm3 }
  0xe2   : > { %vm346_vm7 = vmor %vm342_vm4, %vm345_vm6 }
  0xe3   : > { %v347_v33 = vsel %vm346_vm7, %v221_v32, %v338_v29  ;;  %v254_v34 = vpop.trf.xlu1  ;;  %v348_v35 = vsel %vm346_vm7, %v253_v30, %v339_v31  ;;  %v222_v36 = vpop.trf.xlu0  ;;  %v572_v32 = vld [vmem:[#allocation12] sm:$0xff] (%p116_p2) }
  0xe4   : > { %vm353_vm8 = vcmp.lt.s32.totalorder %v254_v34, %v348_v35  ;;  %vm351_vm9 = vcmp.gt.s32.totalorder %v222_v36, %v347_v33  ;;  %vm352_vm10 = vcmp.eq.s32.totalorder %v222_v36, %v347_v33 }
  0xe5   : > { %vm354_vm11 = vmand %vm352_vm10, %vm353_vm8 }
  0xe6   : > { %vm355_vm12 = vmor %vm351_vm9, %vm354_vm11 }
  0xe7   : > { %v356_v37 = vsel %vm355_vm12, %v222_v36, %v347_v33  ;;  %v255_v38 = vpop.trf.xlu1  ;;  %v357_v39 = vsel %vm355_vm12, %v254_v34, %v348_v35  ;;  %v223_v40 = vpop.trf.xlu0  ;;  %v573_v33 = vld [vmem:[#allocation14] sm:$0xff] (%p116_p2)  ;;  %v593_v34 = vld [vmem:[#allocation12 + $0x8] sm:$0xff] (%p116_p2)  ;;  %v1592_v36 = vmov (%p116_p2), 839939668  }
  0xe8   : > { %vm362_vm13 = vcmp.lt.s32.totalorder %v255_v38, %v357_v39  ;;  %vm360_vm14 = vcmp.gt.s32.totalorder %v223_v40, %v356_v37  ;;  %vm361_vm15 = vcmp.eq.s32.totalorder %v223_v40, %v356_v37  ;;  %v595_v35 = vld [vmem:[#allocation14 + $0x8] sm:$0xff] (%p116_p2) }
  0xe9   : > { %vm363_vm0 = vmand %vm361_vm15, %vm362_vm13 }
  0xea   : > { %vm364_vm1 = vmor %vm360_vm14, %vm363_vm0 }
  0xeb   : > { %v365_v41 = vsel %vm364_vm1, %v223_v40, %v356_v37  ;;  %v256_v42 = vpop.trf.xlu1  ;;  %v366_v43 = vsel %vm364_vm1, %v255_v38, %v357_v39  ;;  %v224_v44 = vpop.trf.xlu0  ;;  %v648_v37 = vunpack.c.l.s4 (%p116_p2), %v1592_v36 }
  0xec   : > { %vm371_vm2 = vcmp.lt.s32.totalorder %v256_v42, %v366_v43  ;;  %vm369_vm3 = vcmp.gt.s32.totalorder %v224_v44, %v365_v41  ;;  %vm370_vm4 = vcmp.eq.s32.totalorder %v224_v44, %v365_v41 }
  0xed   : > { %vm372_vm5 = vmand %vm370_vm4, %vm371_vm2  ;;  %v649_v38 = vunpack.c.0.s8 (%p116_p2), %v648_v37 }
  0xee   : > { %vm373_vm6 = vmor %vm369_vm3, %vm372_vm5 }
  0xef   : > { %v374_v45 = vsel %vm373_vm6, %v224_v44, %v365_v41  ;;  %v257_v46 = vpop.trf.xlu1  ;;  %v375_v47 = vsel %vm373_vm6, %v256_v42, %v366_v43  ;;  %v225_v48 = vpop.trf.xlu0  ;;  %v1593_v42 = vmov (%p116_p2), 1417023538  }
  0xf0   : > { %vm380_vm7 = vcmp.lt.s32.totalorder %v257_v46, %v375_v47  ;;  %vm378_vm8 = vcmp.gt.s32.totalorder %v225_v48, %v374_v45  ;;  %vm379_vm9 = vcmp.eq.s32.totalorder %v225_v48, %v374_v45  ;;  %v676_v43 = vunpack.c.l.s4 (%p116_p2), %v1593_v42 }
  0xf1   : > { %vm381_vm10 = vmand %vm379_vm9, %vm380_vm7 }
  0xf2   : > { %vm382_vm11 = vmor %vm378_vm8, %vm381_vm10 }
  0xf3   : > { %v383_v49 = vsel %vm382_vm11, %v225_v48, %v374_v45  ;;  %v258_v50 = vpop.trf.xlu1  ;;  %v384_v51 = vsel %vm382_vm11, %v257_v46, %v375_v47  ;;  %v226_v52 = vpop.trf.xlu0  ;;  %v1649_v48 = vsub.s32 (%p116_p2), %v649_v38, %v1624_v9 }
  0xf4   : > { %vm389_vm12 = vcmp.lt.s32.totalorder %v258_v50, %v384_v51  ;;  %vm387_vm13 = vcmp.gt.s32.totalorder %v226_v52, %v383_v49  ;;  %vm388_vm14 = vcmp.eq.s32.totalorder %v226_v52, %v383_v49 }
  0xf5   : > { %vm390_vm15 = vmand %vm388_vm14, %vm389_vm12 }
  0xf6   : > { %vm391_vm0 = vmor %vm387_vm13, %vm390_vm15 }
  0xf7   : > { %v392_v53 = vsel %vm391_vm0, %v226_v52, %v383_v49  ;;  %v393_v54 = vsel %vm391_vm0, %v258_v50, %v384_v51  ;;  %v669_v49 = vand.u32 (%p116_p2), 4, %v1624_v9  ;;  %v677_v50 = vunpack.c.0.s8 (%p116_p2), %v676_v43 }
  0xf8   : > { %v395_v55 = vrot.slane %v392_v53, 1  ;;  %v396_v56 = vrot.slane %v393_v54, 1 }
  0xfa   : > { %vm398_vm1 = vcmp.gt.s32.totalorder %v395_v55, %v392_v53  ;;  %vm399_vm2 = vcmp.eq.s32.totalorder %v395_v55, %v392_v53  ;;  %vm400_vm3 = vcmp.lt.s32.totalorder %v396_v56, %v393_v54 }
  0xfb   : > { %vm401_vm4 = vmand %vm399_vm2, %vm400_vm3 }
  0xfc   : > { %vm402_vm5 = vmor %vm398_vm1, %vm401_vm4 }
  0xfd   : > { %v403_v57 = vsel %vm402_vm5, %v395_v55, %v392_v53  ;;  %v404_v58 = vsel %vm402_vm5, %v396_v56, %v393_v54 }
  0xfe   : > { %v406_v59 = vrot.slane %v403_v57, 1  ;;  %v407_v60 = vrot.slane %v404_v58, 1 }
 0x100   : > { %vm409_vm6 = vcmp.gt.s32.totalorder %v406_v59, %v403_v57  ;;  %vm410_vm7 = vcmp.eq.s32.totalorder %v406_v59, %v403_v57  ;;  %vm411_vm8 = vcmp.lt.s32.totalorder %v407_v60, %v404_v58 }
 0x101   : > { %vm412_vm9 = vmand %vm410_vm7, %vm411_vm8 }
 0x102   : > { %vm413_vm10 = vmor %vm409_vm6, %vm412_vm9 }
 0x103   : > { %v414_v61 = vsel %vm413_vm10, %v406_v59, %v403_v57  ;;  %v415_v62 = vsel %vm413_vm10, %v407_v60, %v404_v58  ;;  %v1878_v58 = vmov (%p116_p2), 0 }
 0x104   : > { %v417_v63 = vrot.slane %v414_v61, 1  ;;  %v418_v0 = vrot.slane %v415_v62, 1 }
 0x106   : > { %vm422_vm11 = vcmp.lt.s32.totalorder %v418_v0, %v415_v62  ;;  %vm420_vm12 = vcmp.gt.s32.totalorder %v417_v63, %v414_v61  ;;  %vm421_vm13 = vcmp.eq.s32.totalorder %v417_v63, %v414_v61 }
 0x107   : > { %vm423_vm14 = vmand %vm421_vm13, %vm422_vm11 }
 0x108   : > { %vm424_vm15 = vmor %vm420_vm12, %vm423_vm14 }
 0x109   : > { %v425_v1 = vsel %vm424_vm15, %v417_v63, %v414_v61  ;;  %v426_v3 = vsel %vm424_vm15, %v418_v0, %v415_v62  ;;  %v1594_v62 = vmov (%p116_p2), 1732584193   ;;  %v1677_v0 = vsub.s32 (%p116_p2), %v677_v50, %v1624_v9 }
 0x10a   : > { %v428_v4 = vrot.slane %v425_v1, 1  ;;  %v429_v5 = vrot.slane %v426_v3, 1  ;;  %v704_v63 = vunpack.c.l.s4 (%p116_p2), %v1594_v62 }
 0x10c   : > { %vm431_vm0 = vcmp.gt.s32.totalorder %v428_v4, %v425_v1  ;;  %vm432_vm1 = vcmp.eq.s32.totalorder %v428_v4, %v425_v1  ;;  %vm433_vm2 = vcmp.lt.s32.totalorder %v429_v5, %v426_v3 }
 0x10d   : > { %vm434_vm3 = vmand %vm432_vm1, %vm433_vm2 }
 0x10e   : > { %vm435_vm4 = vmor %vm431_vm0, %vm434_vm3 }
 0x10f   : > { %v436_v6 = vsel %vm435_vm4, %v428_v4, %v425_v1  ;;  %v437_v7 = vsel %vm435_vm4, %v429_v5, %v426_v3  ;;  %v697_v3 = vand.u32 (%p116_p2), 2, %v1624_v9 }
 0x110   : > { %v439_v8 = vrot.slane %v436_v6, 1  ;;  %v440_v10 = vrot.slane %v437_v7, 1 }
 0x112   : > { %vm442_vm5 = vcmp.gt.s32.totalorder %v439_v8, %v436_v6  ;;  %vm443_vm6 = vcmp.eq.s32.totalorder %v439_v8, %v436_v6  ;;  %vm444_vm7 = vcmp.lt.s32.totalorder %v440_v10, %v437_v7 }
 0x113   : > { %vm445_vm8 = vmand %vm443_vm6, %vm444_vm7 }
 0x114   : > { %vm446_vm9 = vmor %vm442_vm5, %vm445_vm8 }
 0x115   : > { %v447_v11 = vsel %vm446_vm9, %v439_v8, %v436_v6  ;;  %v448_v12 = vsel %vm446_vm9, %v440_v10, %v437_v7  ;;  %v705_v8 = vunpack.c.0.s8 (%p116_p2), %v704_v63 }
 0x116   : > { %v450_v13 = vrot.slane %v447_v11, 1  ;;  %v451_v14 = vrot.slane %v448_v12, 1 }
 0x118   : > { %vm453_vm10 = vcmp.gt.s32.totalorder %v450_v13, %v447_v11  ;;  %vm454_vm11 = vcmp.eq.s32.totalorder %v450_v13, %v447_v11  ;;  %vm455_vm12 = vcmp.lt.s32.totalorder %v451_v14, %v448_v12 }
 0x119   : > { %vm456_vm13 = vmand %vm454_vm11, %vm455_vm12 }
 0x11a   : > { %vm457_vm14 = vmor %vm453_vm10, %vm456_vm13 }
 0x11b   : > { %v458_v15 = vsel %vm457_vm14, %v450_v13, %v447_v11  ;;  %v459_v16 = vsel %vm457_vm14, %v451_v14, %v448_v12  ;;  %v1880_v12 = vmov (%p116_p2), 0 }
 0x11c   : > { %v461_v17 = vrot.slane %v458_v15, 1  ;;  %v462_v18 = vrot.slane %v459_v16, 1 }
 0x11e   : > { %vm464_vm15 = vcmp.gt.s32.totalorder %v461_v17, %v458_v15  ;;  %vm465_vm0 = vcmp.eq.s32.totalorder %v461_v17, %v458_v15  ;;  %vm466_vm1 = vcmp.lt.s32.totalorder %v462_v18, %v459_v16 }
 0x11f   : > { %vm467_vm2 = vmand %vm465_vm0, %vm466_vm1 }
 0x120   : > { %vm468_vm3 = vmor %vm464_vm15, %vm467_vm2 }
 0x121   : > { %v470_v19 = vsel %vm468_vm3, %v462_v18, %v459_v16  ;;  %v469_v20 = vsel %vm468_vm3, %v461_v17, %v458_v15  ;;  %v1707_v15 = vsub.s32 (%p116_p2), %v705_v8, %v1624_v9 }
 0x122   : > { %477 = vxpose.xlu0.b32.start.end [1/1] (short) (narrow) %v470_v19, 8  ;;  %473 = vst [vmem:[%s472_s17] sm:$0x1] %v469_v20  ;;  %475 = vst [vmem:[%s474_s18] sm:$0x1] %v470_v19  ;;  %v725_v19 = vand.u32 (%p116_p2), 1, %v1624_v9  ;;  %v1886_v9 = vmov (%p116_p2), 0  ;;  %s1461_s17 = sshll.u32 (%p116_p2), %s1595_s0, 4  ;;  %s1462_s17 = int_to_ptr.vmem [resolvable:$true] %s1461_s17 }
 0x123   :  { %s1554_s18 = scalar_lea.vmem (%p116_p2), %s1462_s17, 32  ;;  %p1559_p4 = scmp.lt.s32.totalorder (%p116_p2), %s1462_s17, %s1462_s17 }
 0x124   :  { %p1555_p3 = scmp.ne.s32.totalorder (%p116_p2), %s1462_s17, %s1554_s18  ;;  %p1560_p5 = scmp.lt.s32.totalorder (%p116_p2), %s1554_s18, %s1554_s18 }
 0x126   :  { %p1561_p6 = por (%p116_p2), %p1560_p5, %p1559_p4 }
 0x128   :  { %p1562_p7 = pnand (%p116_p2), %p1561_p6, %p1555_p3 }
 0x129   :  { %v559_v28 = vld [vmem:[#allocation13 + $0x7] ss:$-1 sm:$0xff] (%p116_p2)  ;;  %v561_v29 = vld [vmem:[#allocation13 + $0xf] ss:$-1 sm:$0xff] (%p116_p2) }
 0x12a   :  { %v566_v30 = vld [vmem:[#allocation15 + $0x7] ss:$-1 sm:$0xff] (%p116_p2)  ;;  %v568_v31 = vld [vmem:[#allocation15 + $0xf] ss:$-1 sm:$0xff] (%p116_p2)  ;;  %vm578_vm6 = vcmp.gt.s32.totalorder (%p116_p2), %v572_v32, %v561_v29  ;;  %vm579_vm7 = vcmp.eq.s32.totalorder (%p116_p2), %v572_v32, %v561_v29  ;;  %vm602_vm10 = vcmp.gt.s32.totalorder (%p116_p2), %v593_v34, %v559_v28  ;;  %vm603_vm11 = vcmp.eq.s32.totalorder (%p116_p2), %v593_v34, %v559_v28 }
 0x12b   :  { %vm580_vm8 = vcmp.lt.s32.totalorder (%p116_p2), %v573_v33, %v568_v31  ;;  %vm604_vm12 = vcmp.lt.s32.totalorder (%p116_p2), %v595_v35, %v566_v30 }
 0x12c   :  { %vm581_vm9 = vmand (%p116_p2), %vm579_vm7, %vm580_vm8 }
 0x12d   :  { %vm582_vm13 = vmor (%p116_p2), %vm578_vm6, %vm581_vm9 }
 0x12e   :  { %v583_v39 = vsel (%p116_p2), %vm582_vm13, %v572_v32, %v561_v29  ;;  %vm605_vm14 = vmand (%p116_p2), %vm603_vm11, %vm604_vm12  ;;  %v1640_v40 = vsel (%p116_p2), %vm582_vm13, %v561_v29, %v572_v32  ;;  %v1642_v41 = vsel (%p116_p2), %vm582_vm13, %v568_v31, %v573_v33 }
 0x12f   :  { %vm606_vm15 = vmor (%p116_p2), %vm602_vm10, %vm605_vm14  ;;  %vm1664_vm10 = vcmp.ne.s32.totalorder (%p116_p2), %v669_v49, 0 }
 0x130   :  { %v608_v44 = vsel (%p116_p2), %vm606_vm15, %v593_v34, %v559_v28  ;;  %v1644_v45 = vsel (%p116_p2), %vm606_vm15, %v559_v28, %v593_v34  ;;  %v614_v46 = vsel (%p116_p2), %vm606_vm15, %v595_v35, %v566_v30  ;;  %v1646_v47 = vsel (%p116_p2), %vm606_vm15, %v566_v30, %v595_v35 }
 0x131   :  { %vm629_vm0 = vcmp.gt.s32.totalorder (%p116_p2), %v583_v39, %v608_v44  ;;  %vm630_vm1 = vcmp.eq.s32.totalorder (%p116_p2), %v583_v39, %v608_v44  ;;  %vm1016_vm7 = vcmp.lt.s32.totalorder (%p116_p2), %v1642_v41, %v1646_v47  ;;  %v1879_v58 = vsel (%p116_p2), %vm1664_vm10, 4294967295, %v1878_v58 }
 0x1a2   : > { %v493_v21 = vpop.trf.xlu0 }
 0x1a3   : > { %v532_v22 = vrot.slane %v493_v21, 1  ;;  %1531 = vpush %v493_v21 }
 0x1a5   : > { %1533 = vpush %v532_v22 }
 0x1d4   : > { %s1532_s19 = spop %1531 }
 0x1d5   : > { %s510_s20 = sshrl.u32 %s1532_s19, 9  ;;  %s512_s21 = ssub.s32 0, %s1532_s19 }
 0x1d6   : > { %p511_p0 = scmp.lt.s32.totalorder %s1532_s19, 0  ;;  %s1523_s22 = smin.u32 %s1532_s19, %s512_s21 }
 0x1d7   : > { %s514_s23 = sand.u32 511, %s1523_s22   ;;  %s1525_s24 = sshll.u32 %s510_s20, 3 }
 0x1d8   : > { %s515_s25 = ssub.s32 0, %s514_s23  ;;  %s1534_s26 = spop %1533 }
 0x1d9   : > { %s1897_s25 = smov (!%p511_p0, %s515_s25), %s514_s23  ;;  %s536_s30 = ssub.s32 0, %s1534_s26 }
 0x1da   : > { %s517_s27 = sshrl.u32 %s1897_s25, 7  ;;  %s519_s28 = sand.u32 127, %s1897_s25  }
 0x1db   : > { %s1524_s29 = sshll.u32 %s517_s27, 8  ;;  %s1527_s4 = smin.u32 %s1534_s26, %s536_s30 }
 0x1dc   : > { %s520_s3 = sadd.s32 %s1524_s29, %s519_s28  ;;  %p535_p1 = scmp.lt.s32.totalorder %s1534_s26, 0 }
 0x1dd   : > { %v522_v23 = vstv %s520_s3  ;;  %s538_s5 = sand.u32 511, %s1527_s4   ;;  %s526_s7 = scalar_lea.vmem [#allocation16], %s1525_s24 }
 0x1de   : > { %vm524_vm4 = vcmp.eq.s32.totalorder %v42_v2, %v522_v23  ;;  %s539_s6 = ssub.s32 0, %s538_s5  ;;  %s529_s8 = scalar_lea.vmem [#allocation17], %s1525_s24 }
 0x1df   : > { %527 = vst.msk [vmem:[%s526_s7] sm:$0xff] %vm524_vm4, %v1590_v24  ;;  %530 = vst.msk [vmem:[%s529_s8] sm:$0xff] %vm524_vm4, %v1591_v25  ;;  %s1899_s6 = smov (!%p535_p1, %s539_s6), %s538_s5  ;;  %s534_s9 = sshrl.u32 %s1534_s26, 9  ;;  %vm1014_vm4 = vcmp.gt.s32.totalorder (%p116_p2), %v1640_v40, %v1644_v45 }
 0x1e0   : > { %s541_s10 = sshrl.u32 %s1899_s6, 7  ;;  %s543_s11 = sand.u32 127, %s1899_s6  }
 0x1e1   : > { %s1528_s12 = sshll.u32 %s541_s10, 8  ;;  %s1529_s14 = sshll.u32 %s534_s9, 3 }
 0x1e2   : > { %s544_s13 = sadd.s32 %s1528_s12, %s543_s11  ;;  %s550_s15 = scalar_lea.vmem [#allocation16], %s1529_s14 }
 0x1e3   : > { %v546_v26 = vstv %s544_s13  ;;  %s553_s16 = scalar_lea.vmem [#allocation17], %s1529_s14  ;;  %118 = sbr.rel (!%p116_p2) target bundleno = 19 (0x13), region = 127 }
 0x1e4   : > { %v547_v27 = vadd.s32 128, %v546_v26 }
 0x1e6   : > { %vm548_vm5 = vcmp.eq.s32.totalorder %v42_v2, %v547_v27  ;;  %v587_v2 = vsel (%p116_p2), %vm582_vm13, %v573_v33, %v568_v31 }
 0x1e7   : > { %551 = vst.msk [vmem:[%s550_s15] sm:$0xff] %vm548_vm5, %v1590_v24  ;;  %554 = vst.msk [vmem:[%s553_s16] sm:$0xff] %vm548_vm5, %v1591_v25  ;;  %vm631_vm2 = vcmp.lt.s32.totalorder (%p116_p2), %v587_v2, %v614_v46  ;;  %vm1015_vm5 = vcmp.eq.s32.totalorder (%p116_p2), %v1640_v40, %v1644_v45 }
 0x1e8   :  { %vm632_vm3 = vmand (%p116_p2), %vm630_vm1, %vm631_vm2 }
 0x1e9   :  { %vm633_vm6 = vmor (%p116_p2), %vm629_vm0, %vm632_vm3 }
 0x1ea   :  { %v634_v51 = vsel %vm633_vm6, %v583_v39, %v608_v44  ;;  %v636_v52 = vsel %vm633_vm6, %v608_v44, %v583_v39  ;;  %v638_v53 = vsel %vm633_vm6, %v587_v2, %v614_v46  ;;  %v640_v54 = vsel %vm633_vm6, %v614_v46, %v587_v2  ;;  %vm1017_vm8 = vmand %vm1015_vm5, %vm1016_vm7 }
 0x1eb   :  { %v653_v55 = vrot.slane %v634_v51, %v1649_v48  ;;  %v660_v56 = vrot.slane %v638_v53, %v1649_v48  ;;  %vm1660_vm9 = vmor %vm1014_vm4, %vm1017_vm8  ;;  %v834_v59 = vrot.slane %v636_v52, %v1649_v48  ;;  %v841_v60 = vrot.slane %v640_v54, %v1649_v48 }
 0x1ec   :  { %v1674_v61 = vsel %vm1660_vm9, %v1640_v40, %v1644_v45  ;;  %v1683_v1 = vsel %vm1660_vm9, %v1642_v41, %v1646_v47  ;;  %vm1696_vm8 = vcmp.ne.s32.totalorder %v697_v3, 0  ;;  %v1751_v38 = vsel %vm1660_vm9, %v1644_v45, %v1640_v40 }
 0x1ed   :  { %vm662_vm11 = vcmp.gt.s32.totalorder %v634_v51, %v653_v55  ;;  %vm663_vm12 = vcmp.eq.s32.totalorder %v634_v51, %v653_v55  ;;  %vm664_vm13 = vcmp.lt.s32.totalorder %v638_v53, %v660_v56  ;;  %vm844_vm15 = vcmp.eq.s32.totalorder %v636_v52, %v834_v59 }
 0x1ee   :  { %vm665_vm14 = vmand %vm663_vm12, %vm664_vm13  ;;  %vm845_vm0 = vcmp.lt.s32.totalorder %v640_v54, %v841_v60  ;;  %vm843_vm2 = vcmp.gt.s32.totalorder %v636_v52, %v834_v59  ;;  %v1038_v4 = vrot.slane %v1674_v61, %v1649_v48  ;;  %v1045_v5 = vrot.slane %v1683_v1, %v1649_v48 }
 0x1ef   :  { %vm666_vm1 = vmor %vm662_vm11, %vm665_vm14  ;;  %v1881_v12 = vsel %vm1696_vm8, 4294967295, %v1880_v12  ;;  %v1757_v39 = vsel %vm1660_vm9, %v1646_v47, %v1642_v41  ;;  %v1767_v40 = vrot.slane %v1751_v38, %v1649_v48 }
 0x1f0   :  { %vm671_vm3 = vmxor %vm666_vm1, %vm1664_vm10  ;;  %vm1048_vm5 = vcmp.eq.s32.totalorder %v1674_v61, %v1038_v4  ;;  %vm1049_vm7 = vcmp.lt.s32.totalorder %v1683_v1, %v1045_v5  ;;  %vm1047_vm1 = vcmp.gt.s32.totalorder %v1674_v61, %v1038_v4  ;;  %v1771_v41 = vrot.slane %v1757_v39, %v1649_v48 }
 0x1f1   :  { %v672_v6 = vsel %vm671_vm3, %v634_v51, %v653_v55  ;;  %v673_v7 = vsel %vm671_vm3, %v638_v53, %v660_v56  ;;  %vm846_vm4 = vmand %vm844_vm15, %vm845_vm0 }
 0x1f2   :  { %v681_v10 = vrot.slane %v672_v6, %v1677_v0  ;;  %v688_v11 = vrot.slane %v673_v7, %v1677_v0  ;;  %vm847_vm6 = vmor %vm843_vm2, %vm846_vm4 }
 0x1f3   :  { %vm852_vm11 = vmxor %vm847_vm6, %vm1664_vm10 }
 0x1f4   :  { %vm690_vm12 = vcmp.gt.s32.totalorder %v672_v6, %v681_v10  ;;  %vm691_vm13 = vcmp.eq.s32.totalorder %v672_v6, %v681_v10  ;;  %vm692_vm14 = vcmp.lt.s32.totalorder %v673_v7, %v688_v11  ;;  %v853_v13 = vsel %vm852_vm11, %v636_v52, %v834_v59  ;;  %vm1702_vm15 = vmand %vm1048_vm5, %vm1049_vm7 }
 0x1f5   :  { %vm693_vm0 = vmand %vm691_vm13, %vm692_vm14  ;;  %v854_v16 = vsel %vm852_vm11, %v640_v54, %v841_v60  ;;  %v862_v17 = vrot.slane %v853_v13, %v1677_v0  ;;  %v1890_v59 = vmov 0 }
 0x1f6   :  { %vm694_vm2 = vmor %vm690_vm12, %vm693_vm0  ;;  %v869_v18 = vrot.slane %v854_v16, %v1677_v0 }
 0x1f7   :  { %vm699_vm3 = vmxor %vm694_vm2, %vm1696_vm8  ;;  %vm871_vm4 = vcmp.gt.s32.totalorder %v853_v13, %v862_v17  ;;  %vm872_vm5 = vcmp.eq.s32.totalorder %v853_v13, %v862_v17  ;;  %vm1723_vm2 = vcmp.ne.s32.totalorder %v725_v19, 0 }
 0x1f8   :  { %v700_v20 = vsel %vm699_vm3, %v672_v6, %v681_v10  ;;  %v701_v21 = vsel %vm699_vm3, %v673_v7, %v688_v11  ;;  %vm873_vm6 = vcmp.lt.s32.totalorder %v854_v16, %v869_v18  ;;  %vm1717_vm7 = vmor %vm1047_vm1, %vm1702_vm15  ;;  %v1887_v9 = vsel %vm1723_vm2, 4294967295, %v1886_v9 }
 0x1f9   :  { %v709_v23 = vrot.slane %v700_v20, %v1707_v15  ;;  %v716_v24 = vrot.slane %v701_v21, %v1707_v15  ;;  %vm874_vm11 = vmand %vm872_vm5, %vm873_vm6 }
 0x1fa   :  { %vm875_vm12 = vmor %vm871_vm4, %vm874_vm11 }
 0x1fb   :  { %vm718_vm13 = vcmp.gt.s32.totalorder %v700_v20, %v709_v23  ;;  %vm719_vm14 = vcmp.eq.s32.totalorder %v700_v20, %v709_v23  ;;  %vm720_vm0 = vcmp.lt.s32.totalorder %v701_v21, %v716_v24  ;;  %vm880_vm3 = vmxor %vm875_vm12, %vm1696_vm8 }
 0x1fc   :  { %vm721_vm15 = vmand %vm719_vm14, %vm720_vm0  ;;  %v881_v25 = vsel %vm880_vm3, %v853_v13, %v862_v17  ;;  %v882_v26 = vsel %vm880_vm3, %v854_v16, %v869_v18 }
 0x1fd   :  { %vm722_vm1 = vmor %vm718_vm13, %vm721_vm15  ;;  %v890_v27 = vrot.slane %v881_v25, %v1707_v15  ;;  %v897_v28 = vrot.slane %v882_v26, %v1707_v15 }
 0x1fe   :  { %vm727_vm4 = vmxor %vm722_vm1, %vm1723_vm2 }
 0x1ff   :  { %v728_v29 = vsel %vm727_vm4, %v700_v20, %v709_v23  ;;  %v729_v30 = vsel %vm727_vm4, %v701_v21, %v716_v24  ;;  %vm899_vm5 = vcmp.gt.s32.totalorder %v881_v25, %v890_v27  ;;  %vm900_vm6 = vcmp.eq.s32.totalorder %v881_v25, %v890_v27  ;;  %vm1056_vm11 = vmxor %vm1717_vm7, %vm1664_vm10 }
 0x200   :  { %v743_v31 = vrot.slane %v728_v29, %v1649_v48  ;;  %v750_v32 = vrot.slane %v729_v30, %v1649_v48  ;;  %vm901_vm12 = vcmp.lt.s32.totalorder %v882_v26, %v897_v28  ;;  %v1057_v33 = vsel %vm1056_vm11, %v1674_v61, %v1038_v4 }
 0x201   :  { %vm902_vm13 = vmand %vm900_vm6, %vm901_vm12  ;;  %v1058_v34 = vsel %vm1056_vm11, %v1683_v1, %v1045_v5  ;;  %v1066_v35 = vrot.slane %v1057_v33, %v1677_v0 }
 0x202   :  { %vm752_vm14 = vcmp.gt.s32.totalorder %v728_v29, %v743_v31  ;;  %vm753_vm0 = vcmp.eq.s32.totalorder %v728_v29, %v743_v31  ;;  %vm754_vm3 = vcmp.lt.s32.totalorder %v729_v30, %v750_v32  ;;  %vm1742_vm15 = vmor %vm899_vm5, %vm902_vm13  ;;  %v1073_v37 = vrot.slane %v1058_v34, %v1677_v0 }
 0x203   :  { %vm755_vm7 = vmand %vm753_vm0, %vm754_vm3  ;;  %vm1076_vm4 = vcmp.eq.s32.totalorder %v1057_v33, %v1066_v35  ;;  %vm1075_vm11 = vcmp.gt.s32.totalorder %v1057_v33, %v1066_v35 }
 0x204   :  { %vm756_vm1 = vmor %vm752_vm14, %vm755_vm7  ;;  %vm1077_vm5 = vcmp.lt.s32.totalorder %v1058_v34, %v1073_v37 }
 0x205   :  { %vm761_vm6 = vmxor %vm756_vm1, %vm1664_vm10 }
 0x206   :  { %v762_v2 = vsel %vm761_vm6, %v728_v29, %v743_v31  ;;  %v763_v42 = vsel %vm761_vm6, %v729_v30, %v750_v32  ;;  %vm908_vm12 = vmxor %vm1742_vm15, %vm1723_vm2  ;;  %vm1229_vm2 = vcmp.eq.s32.totalorder %v1751_v38, %v1767_v40 }
 0x207   :  { %v771_v43 = vrot.slane %v762_v2, %v1677_v0  ;;  %v778_v44 = vrot.slane %v763_v42, %v1677_v0  ;;  %v909_v45 = vsel %vm908_vm12, %v881_v25, %v890_v27  ;;  %v910_v46 = vsel %vm908_vm12, %v882_v26, %v897_v28  ;;  %vm1078_vm9 = vmand %vm1076_vm4, %vm1077_vm5 }
 0x208   :  { %v924_v47 = vrot.slane %v909_v45, %v1649_v48  ;;  %v931_v49 = vrot.slane %v910_v46, %v1649_v48  ;;  %vm1079_vm13 = vmor %vm1075_vm11, %vm1078_vm9  ;;  %vm1230_vm5 = vcmp.lt.s32.totalorder %v1757_v39, %v1771_v41 }
 0x209   :  { %vm780_vm14 = vcmp.gt.s32.totalorder %v762_v2, %v771_v43  ;;  %vm781_vm0 = vcmp.eq.s32.totalorder %v762_v2, %v771_v43  ;;  %vm782_vm3 = vcmp.lt.s32.totalorder %v763_v42, %v778_v44  ;;  %vm1084_vm15 = vmxor %vm1079_vm13, %vm1696_vm8 }
 0x20a   :  { %vm783_vm7 = vmand %vm781_vm0, %vm782_vm3  ;;  %vm934_vm1 = vcmp.eq.s32.totalorder %v909_v45, %v924_v47  ;;  %vm935_vm6 = vcmp.lt.s32.totalorder %v910_v46, %v931_v49  ;;  %v1085_v50 = vsel %vm1084_vm15, %v1057_v33, %v1066_v35  ;;  %vm933_vm4 = vcmp.gt.s32.totalorder %v909_v45, %v924_v47 }
 0x20b   :  { %vm784_vm12 = vmor %vm780_vm14, %vm783_vm7  ;;  %v1086_v51 = vsel %vm1084_vm15, %v1058_v34, %v1073_v37  ;;  %v1094_v52 = vrot.slane %v1085_v50, %v1707_v15 }
 0x20c   :  { %vm789_vm11 = vmxor %vm784_vm12, %vm1696_vm8  ;;  %v1101_v53 = vrot.slane %v1086_v51, %v1707_v15 }
 0x20d   :  { %v790_v54 = vsel %vm789_vm11, %v762_v2, %v771_v43  ;;  %v791_v55 = vsel %vm789_vm11, %v763_v42, %v778_v44  ;;  %vm936_vm9 = vmand %vm934_vm1, %vm935_vm6  ;;  %vm1104_vm13 = vcmp.eq.s32.totalorder %v1085_v50, %v1094_v52 }
 0x20e   :  { %v799_v56 = vrot.slane %v790_v54, %v1707_v15  ;;  %v806_v57 = vrot.slane %v791_v55, %v1707_v15  ;;  %vm937_vm14 = vmor %vm933_vm4, %vm936_vm9  ;;  %vm1105_vm0 = vcmp.lt.s32.totalorder %v1086_v51, %v1101_v53  ;;  %vm1103_vm4 = vcmp.gt.s32.totalorder %v1085_v50, %v1094_v52 }
 0x20f   :  { %vm1792_vm3 = vmand %vm1229_vm2, %vm1230_vm5  ;;  %vm1892_vm2 = vnez %v1887_v9 }
 0x210   :  { %v1891_v59 = vsel %vm1792_vm3, 4294967295, %v1890_v59  ;;  %vm942_vm15 = vmxor %vm937_vm14, %vm1664_vm10  ;;  %vm808_vm7 = vcmp.gt.s32.totalorder %v790_v54, %v799_v56  ;;  %vm809_vm12 = vcmp.eq.s32.totalorder %v790_v54, %v799_v56  ;;  %vm810_vm1 = vcmp.lt.s32.totalorder %v791_v55, %v806_v57 }
 0x211   :  { %v943_v60 = vsel %vm942_vm15, %v909_v45, %v924_v47  ;;  %vm1106_vm6 = vmand %vm1104_vm13, %vm1105_vm0  ;;  %v944_v61 = vsel %vm942_vm15, %v910_v46, %v931_v49  ;;  %vm1228_vm15 = vcmp.gt.s32.totalorder %v1751_v38, %v1767_v40 }
 0x212   :  { %vm811_vm11 = vmand %vm809_vm12, %vm810_vm1  ;;  %v952_v62 = vrot.slane %v943_v60, %v1677_v0  ;;  %v959_v63 = vrot.slane %v944_v61, %v1677_v0 }
 0x213   :  { %vm812_vm9 = vmor %vm808_vm7, %vm811_vm11  ;;  %vm1893_vm7 = vnez %v1881_v12 }
 0x214   :  { %vm817_vm5 = vmxor %vm812_vm9, %vm1892_vm2  ;;  %vm961_vm3 = vcmp.gt.s32.totalorder %v943_v60, %v952_v62  ;;  %vm962_vm8 = vcmp.eq.s32.totalorder %v943_v60, %v952_v62  ;;  %vm963_vm14 = vcmp.lt.s32.totalorder %v944_v61, %v959_v63 }
 0x215   :  { %v818_v1 = vsel %vm817_vm5, %v790_v54, %v799_v56  ;;  %v819_v3 = vsel %vm817_vm5, %v791_v55, %v806_v57  ;;  %vm1107_vm10 = vmor %vm1103_vm4, %vm1106_vm6  ;;  %vm1895_vm6 = vnez %v1879_v58 }
 0x216   :  { %821 = vst [vmem:[#allocation12] sm:$0xff] %v818_v1  ;;  %822 = vst [vmem:[#allocation14] sm:$0xff] %v819_v3 }
 0x217   :  { %vm964_vm13 = vmand %vm962_vm8, %vm963_vm14  ;;  %vm1894_vm8 = vnez %v1891_v59 }
 0x218   :  { %vm965_vm0 = vmor %vm961_vm3, %vm964_vm13 }
 0x219   :  { %vm970_vm12 = vmxor %vm965_vm0, %vm1893_vm7 }
 0x21a   :  { %v971_v4 = vsel %vm970_vm12, %v943_v60, %v952_v62  ;;  %v972_v5 = vsel %vm970_vm12, %v944_v61, %v959_v63  ;;  %vm1112_vm1 = vmxor %vm1107_vm10, %vm1892_vm2 }
 0x21b   :  { %v980_v6 = vrot.slane %v971_v4, %v1707_v15  ;;  %v987_v7 = vrot.slane %v972_v5, %v1707_v15  ;;  %v1113_v8 = vsel %vm1112_vm1, %v1085_v50, %v1094_v52  ;;  %v1114_v10 = vsel %vm1112_vm1, %v1086_v51, %v1101_v53  ;;  %vm1232_vm3 = vmor %vm1228_vm15, %vm1894_vm8 }
 0x21c   :  { %v1128_v11 = vrot.slane %v1113_v8, %v1649_v48  ;;  %v1135_v13 = vrot.slane %v1114_v10, %v1649_v48  ;;  %vm1237_vm11 = vmxor %vm1232_vm3, %vm1895_vm6 }
 0x21d   :  { %vm989_vm4 = vcmp.gt.s32.totalorder %v971_v4, %v980_v6  ;;  %vm990_vm9 = vcmp.eq.s32.totalorder %v971_v4, %v980_v6  ;;  %vm991_vm5 = vcmp.lt.s32.totalorder %v972_v5, %v987_v7  ;;  %v1238_v14 = vsel %vm1237_vm11, %v1751_v38, %v1767_v40  ;;  %v1423_v12 = vld [vmem:[#allocation14] sm:$0xff] }
 0x21e   :  { %vm992_vm10 = vmand %vm990_vm9, %vm991_vm5  ;;  %vm1138_vm14 = vcmp.eq.s32.totalorder %v1113_v8, %v1128_v11  ;;  %vm1139_vm13 = vcmp.lt.s32.totalorder %v1114_v10, %v1135_v13  ;;  %v1239_v16 = vsel %vm1237_vm11, %v1757_v39, %v1771_v41  ;;  %vm1137_vm15 = vcmp.gt.s32.totalorder %v1113_v8, %v1128_v11  ;;  %v1390_v45 = vld [vmem:[#allocation12] sm:$0xff]  ;;  %1426 = vxpose.xlu0.b32.start [1/2] (short) (narrow) %v1423_v12, 8 }
 0x21f   :  { %vm993_vm0 = vmor %vm989_vm4, %vm992_vm10  ;;  %v1247_v17 = vrot.slane %v1238_v14, %v1677_v0  ;;  %v1254_v18 = vrot.slane %v1239_v16, %v1677_v0  ;;  %v1392_v46 = vsub.s32 2147483647, %v1390_v45 }
 0x220   :  { %vm998_vm12 = vmxor %vm993_vm0, %vm1892_vm2 }
 0x221   :  { %v999_v19 = vsel %vm998_vm12, %v971_v4, %v980_v6  ;;  %v1000_v20 = vsel %vm998_vm12, %v972_v5, %v987_v7  ;;  %vm1140_vm1 = vmand %vm1138_vm14, %vm1139_vm13  ;;  %vm1257_vm8 = vcmp.eq.s32.totalorder %v1238_v14, %v1247_v17  ;;  %vm1256_vm9 = vcmp.gt.s32.totalorder %v1238_v14, %v1247_v17 }
 0x222   :  { %1002 = vst [vmem:[#allocation12 + $0x8] sm:$0xff] %v999_v19  ;;  %1003 = vst [vmem:[#allocation14 + $0x8] sm:$0xff] %v1000_v20  ;;  %vm1258_vm5 = vcmp.lt.s32.totalorder %v1239_v16, %v1254_v18 }
 0x223   :  { %vm1141_vm3 = vmor %vm1137_vm15, %vm1140_vm1 }
 0x224   :  { %vm1146_vm11 = vmxor %vm1141_vm3, %vm1895_vm6 }
 0x225   :  { %v1147_v21 = vsel %vm1146_vm11, %v1113_v8, %v1128_v11  ;;  %v1148_v22 = vsel %vm1146_vm11, %v1114_v10, %v1135_v13  ;;  %vm1259_vm4 = vmand %vm1257_vm8, %vm1258_vm5 }
 0x226   :  { %v1156_v23 = vrot.slane %v1147_v21, %v1677_v0  ;;  %v1163_v24 = vrot.slane %v1148_v22, %v1677_v0  ;;  %vm1260_vm10 = vmor %vm1256_vm9, %vm1259_vm4 }
 0x227   :  { %vm1265_vm14 = vmxor %vm1260_vm10, %vm1893_vm7 }
 0x228   :  { %vm1165_vm13 = vcmp.gt.s32.totalorder %v1147_v21, %v1156_v23  ;;  %vm1166_vm0 = vcmp.eq.s32.totalorder %v1147_v21, %v1156_v23  ;;  %vm1167_vm12 = vcmp.lt.s32.totalorder %v1148_v22, %v1163_v24  ;;  %v1266_v25 = vsel %vm1265_vm14, %v1238_v14, %v1247_v17 }
 0x229   :  { %vm1168_vm15 = vmand %vm1166_vm0, %vm1167_vm12  ;;  %v1267_v26 = vsel %vm1265_vm14, %v1239_v16, %v1254_v18  ;;  %v1275_v27 = vrot.slane %v1266_v25, %v1707_v15  ;;  %v1396_v47 = vld [vmem:[#allocation12 + $0x8] sm:$0xff] }
 0x22a   :  { %vm1169_vm1 = vmor %vm1165_vm13, %vm1168_vm15  ;;  %v1282_v28 = vrot.slane %v1267_v26, %v1707_v15  ;;  %v1425_v49 = vld [vmem:[#allocation14 + $0x8] sm:$0xff] }
 0x22b   :  { %vm1174_vm8 = vmxor %vm1169_vm1, %vm1893_vm7  ;;  %vm1284_vm3 = vcmp.gt.s32.totalorder %v1266_v25, %v1275_v27  ;;  %vm1285_vm5 = vcmp.eq.s32.totalorder %v1266_v25, %v1275_v27  ;;  %1427 = vxpose.xlu0.b32.end [2/2] (short) (narrow) %v1425_v49, 8 }
 0x22c   :  { %v1175_v29 = vsel %vm1174_vm8, %v1147_v21, %v1156_v23  ;;  %v1176_v30 = vsel %vm1174_vm8, %v1148_v22, %v1163_v24  ;;  %vm1286_vm9 = vcmp.lt.s32.totalorder %v1267_v26, %v1282_v28 }
 0x22d   :  { %v1184_v31 = vrot.slane %v1175_v29, %v1707_v15  ;;  %v1191_v32 = vrot.slane %v1176_v30, %v1707_v15  ;;  %vm1287_vm11 = vmand %vm1285_vm5, %vm1286_vm9 }
 0x22e   :  { %vm1288_vm4 = vmor %vm1284_vm3, %vm1287_vm11 }
 0x22f   :  { %vm1193_vm10 = vcmp.gt.s32.totalorder %v1175_v29, %v1184_v31  ;;  %vm1194_vm14 = vcmp.eq.s32.totalorder %v1175_v29, %v1184_v31  ;;  %vm1195_vm0 = vcmp.lt.s32.totalorder %v1176_v30, %v1191_v32  ;;  %vm1293_vm13 = vmxor %vm1288_vm4, %vm1892_vm2 }
 0x230   :  { %vm1196_vm12 = vmand %vm1194_vm14, %vm1195_vm0  ;;  %v1294_v33 = vsel %vm1293_vm13, %v1266_v25, %v1275_v27  ;;  %v1295_v34 = vsel %vm1293_vm13, %v1267_v26, %v1282_v28 }
 0x231   :  { %vm1197_vm15 = vmor %vm1193_vm10, %vm1196_vm12  ;;  %v1309_v35 = vrot.slane %v1294_v33, %v1649_v48  ;;  %v1316_v36 = vrot.slane %v1295_v34, %v1649_v48 }
 0x232   :  { %vm1202_vm1 = vmxor %vm1197_vm15, %vm1892_vm2 }
 0x233   :  { %v1203_v37 = vsel %vm1202_vm1, %v1175_v29, %v1184_v31  ;;  %v1204_v38 = vsel %vm1202_vm1, %v1176_v30, %v1191_v32  ;;  %vm1318_vm8 = vcmp.gt.s32.totalorder %v1294_v33, %v1309_v35  ;;  %vm1319_vm3 = vcmp.eq.s32.totalorder %v1294_v33, %v1309_v35 }
 0x234   :  { %1206 = vst [vmem:[#allocation13] sm:$0xff] %v1203_v37  ;;  %1207 = vst [vmem:[#allocation15] sm:$0xff] %v1204_v38  ;;  %vm1320_vm5 = vcmp.lt.s32.totalorder %v1295_v34, %v1316_v36 }
 0x235   :  { %vm1321_vm9 = vmand %vm1319_vm3, %vm1320_vm5 }
 0x236   :  { %vm1322_vm11 = vmor %vm1318_vm8, %vm1321_vm9 }
 0x237   :  { %vm1327_vm4 = vmxor %vm1322_vm11, %vm1895_vm6  ;;  %vm1397_vm11 = vcmp.lt.s32.totalorder %v1396_v47, 0 }
 0x238   :  { %v1328_v39 = vsel %vm1327_vm4, %v1294_v33, %v1309_v35  ;;  %v1329_v2 = vsel %vm1327_vm4, %v1295_v34, %v1316_v36 }
 0x239   :  { %v1337_v42 = vrot.slane %v1328_v39, %v1677_v0  ;;  %v1344_v48 = vrot.slane %v1329_v2, %v1677_v0 }
 0x23b   :  { %vm1346_vm10 = vcmp.gt.s32.totalorder %v1328_v39, %v1337_v42  ;;  %vm1347_vm14 = vcmp.eq.s32.totalorder %v1328_v39, %v1337_v42  ;;  %vm1348_vm0 = vcmp.lt.s32.totalorder %v1329_v2, %v1344_v48 }
 0x23c   :  { %vm1349_vm13 = vmand %vm1347_vm14, %vm1348_vm0 }
 0x23d   :  { %vm1350_vm12 = vmor %vm1346_vm10, %vm1349_vm13 }
 0x23e   :  { %vm1355_vm15 = vmxor %vm1350_vm12, %vm1893_vm7  ;;  %vm1391_vm7 = vcmp.lt.s32.totalorder %v1390_v45, 0 }
 0x23f   :  { %v1356_v40 = vsel %vm1355_vm15, %v1328_v39, %v1337_v42  ;;  %v1357_v41 = vsel %vm1355_vm15, %v1329_v2, %v1344_v48  ;;  %v1393_v50 = vsel %vm1391_vm7, %v1392_v46, %v1390_v45 }
 0x240   :  { %v1365_v43 = vrot.slane %v1356_v40, %v1707_v15  ;;  %v1372_v58 = vrot.slane %v1357_v41, %v1707_v15  ;;  %v1398_v15 = vsub.s32 2147483647, %v1396_v47  ;;  %1394 = vst [vmem:[#allocation12] sm:$0xff] %v1393_v50  ;;  %1404 = vxpose.xlu1.b32.start [1/2] (short) (narrow) %v1393_v50, 8 }
 0x242   :  { %vm1374_vm6 = vcmp.gt.s32.totalorder %v1356_v40, %v1365_v43  ;;  %vm1375_vm1 = vcmp.eq.s32.totalorder %v1356_v40, %v1365_v43  ;;  %vm1376_vm8 = vcmp.lt.s32.totalorder %v1357_v41, %v1372_v58  ;;  %v1399_v51 = vsel %vm1397_vm11, %v1398_v15, %v1396_v47 }
 0x243   :  { %vm1377_vm3 = vmand %vm1375_vm1, %vm1376_vm8  ;;  %1400 = vst [vmem:[#allocation12 + $0x8] sm:$0xff] %v1399_v51 }
 0x244   :  { %vm1378_vm5 = vmor %vm1374_vm6, %vm1377_vm3  ;;  %1405 = vxpose.xlu1.b32.end [2/2] (short) (narrow) %v1399_v51, 8 }
 0x245   :  { %vm1383_vm9 = vmxor %vm1378_vm5, %vm1892_vm2 }
 0x246   :  { %v1384_v0 = vsel %vm1383_vm9, %v1356_v40, %v1365_v43  ;;  %v1385_v44 = vsel %vm1383_vm9, %v1357_v41, %v1372_v58 }
 0x247   :  { %1387 = vst [vmem:[#allocation13 + $0x8] sm:$0xff] %v1384_v0  ;;  %1388 = vst [vmem:[#allocation15 + $0x8] sm:$0xff] %v1385_v44 }
 0x2a7   :  { %v1428_v9 = vpop.trf.xlu0 }
 0x2a8   :  { %1444 = vst [vmem:[#allocation10] sm:$0xff] %v1428_v9 }
 0x2af   :  { %v1454_v53 = vld [vmem:[#allocation10] sm:$0x3] }
 0x2b0   :  { %1456 = vst [vmem:[#allocation11] sm:$0x3] %v1454_v53 }
 0x2c0   :  { %v1406_v52 = vpop.trf.xlu1 }
 0x2c1   :  { %1422 = vst [vmem:[#allocation7] sm:$0xff] %v1406_v52 }
 0x2c8   :  { %v1448_v54 = vld [vmem:[#allocation7] sm:$0x3] }
 0x2c9   :  { %1450 = vst [vmem:[#allocation8] sm:$0x3] %v1448_v54 }
 0x2ca   :  { %1565 = shalt.err (!%p1562_p7)
}
 0x2cb   :  { %s1566_s21 = scalar_lea.hbm %s1868_s1, 32 }
 0x2cc   :  { %p1567_p8 = scmp.ne.s32.totalorder %s1868_s1, %s1566_s21  ;;  %p1570_p9 = scmp.lt.u32.totalorder %s1566_s21, %s1868_s1 }
 0x2ce   :  { %p1572_p10 = pnand %p1570_p9, %p1567_p8 }
 0x2d0   :  { %1575 = shalt.err (!%p1572_p10)
}
 0x2d1   :  { %1464 = dma.vmem_to_hbm [thread:$0]  %s1462_s17, 32, %s1868_s1, [#allocation9]   ;;  %v1480_v55 = vld [vmem:[#allocation11] sm:$0x3] }
 0x2d2   :  { %1481 = vst [vmem:[%s1869_s2] sm:$0x3] %v1480_v55 }
 0x2d3   :  { %1580 = dma.done.wait [#allocation9], 32  }
 0x2d4   :  { %1581 = vsyncadd [#allocation9], 4294967264 }
 0x2d5   :  { %1497 = vsyncpa [#allocation9], 1 }

// kernel: _post_process_core.1
= control target key start
LH: loop header
LB: loop body
LE: loop exit
PB: predicated region body
PF: predicated region fallthrough
CT: control target
= control target key end

     0   :  { %7 = vsyncpa [#allocation3], 0  ;;  %s738_s0 = inlined_call_operand.hbm [shape: f32[32,32], index: 0, kind: input, shape index: {}]   ;;  %s739_s1 = inlined_call_operand.hbm [shape: f32[32,128], index: 1, kind: input, shape index: {}]   ;;  %s740_s2 = inlined_call_operand.vmem [shape: f32[32,128], index: 2, kind: output, shape index: {}]  }
   0x1   :  { %9 = vsyncpa [#allocation3 + $0x1], 0 }
   0x2   :  { %10 = vsyncpa [#allocation5], 0  ;;  %s587_s9 = smov 0   ;;  %s589_s10 = smov 0  }
   0x3   :  { %s591_s11 = smov 0   ;;  %s593_s12 = smov 0  }
   0x4 LB: > { %s365_s13 = sadd.s32 4294967295, %s566_s12   ;;  %p36_p0 = scmp.ne.s32.totalorder %s558_s10, %s554_s9  ;;  %s566_s12 = sphi %s593_s12, %s756_s12   ;;  %s562_s11 = sphi %s591_s11, %s755_s11   ;;  %s558_s10 = sphi %s589_s10, %s754_s10   ;;  %s554_s9 = sphi %s587_s9, %s753_s9  }
   0x5   : > { %p609_p1 = scmp.eq.s32.totalorder %s365_s13, 0  ;;  %p367_p2 = scmp.ge.s32.totalorder %s566_s12, 1 }
   0x6   : > { %p94_p3 = scmp.lt.s32.totalorder %s566_s12, 3  ;;  %s568_s17 = smov [#allocation4]  }
   0x7   : > { %s745_s14 = scalar_select %p609_p1, 1, 0 }
   0x8   : > { %p617_p4 = por %p609_p1, %p36_p0  ;;  %p621_p5 = pnand %p367_p2, %p94_p3 }
   0x9   : > { %s106_s18 = sshll.u32 %s568_s17, 4  ;;  %s634_s20 = sadd.s32 1, %s566_s12   ;;  %s107_s18 = int_to_ptr.vmem [resolvable:$true] %s106_s18 }
   0xa   : > { %s746_s15 = scalar_select %p617_p4, 1, 0 }
   0xb   : > { %s747_s16 = scalar_select %p621_p5, 1, 0 }
   0xc   : > { %p416_p6 = pneg %p621_p5  ;;  %s23_s21 = sadd.s32 1, %s562_s11 }
   0xd   : > { %s20_s22 = ssub.s32 %s566_s12, %s634_s20  ;;  %s470_s25 = scalar_lea.hbm %s739_s1, 512 }
   0xe   : > { %p629_p7 = pnand %p416_p6, %p609_p1  ;;  %p471_p8 = scmp.ne.s32.totalorder %s739_s1, %s470_s25 }
   0xf   : > { %p477_p12 = scmp.lt.u32.totalorder %s470_s25, %s739_s1 }
  0x10   : > { %p472_p9 = pneg %p629_p7 }
  0x12   : > { %p473_p10 = pnand %p472_p9, %p471_p8 }
  0x14   : > { %p474_p11 = pneg %p473_p10 }
  0x16   : > { %p479_p13 = pnand %p477_p12, %p474_p11 }
  0x18   : > { %482 = shalt.err (!%p479_p13)
}
  0x19   : > { %s483_s30 = scalar_lea.vmem %s107_s18, 512  ;;  %p491_p6 = scmp.lt.s32.totalorder %s107_s18, %s107_s18 }
  0x1a   : > { %p484_p0 = scmp.ne.s32.totalorder %s107_s18, %s483_s30  ;;  %p492_p1 = scmp.lt.s32.totalorder %s483_s30, %s483_s30 }
  0x1c   : > { %p486_p2 = pnand %p484_p0, %p472_p9  ;;  %p493_p4 = por %p492_p1, %p491_p6 }
  0x1e   : > { %p487_p3 = pneg %p486_p2 }
  0x20   : > { %p494_p5 = pnand %p493_p4, %p487_p3 }
  0x22   : > { %497 = shalt.err (!%p494_p5)
}
  0x23   : > { %s569_s3 = smov 128   ;;  %s570_s4 = smov 8  }
  0x24   : > { %419 = dma.hbm_to_vmem [thread:$0]  (!%p629_p7), %s739_s1, 512, %s107_s18, [#allocation5], %s569_s3, %s569_s3, %s570_s4  }
  0x25   : > { %p21_p1 = scmp.eq.s32.totalorder %s20_s22, 0  ;;  %p30_p4 = scmp.ne.s32.totalorder %s562_s11, %s558_s10 }
  0x26   : > { %p31_p5 = scmp.eq.s32.totalorder %s566_s12, 0  ;;  %p425_p8 = scmp.lt.s32.totalorder %s566_s12, 2 }
  0x27   : > { %s663_s7 = scalar_select %p21_p1, %s562_s11, %s23_s21  }
  0x28   : > { %p32_p9 = por %p31_p5, %p30_p4  ;;  %s120_s8 = sand.u32 1, %s562_s11  }
  0x29   : > { %s370_s9 = sshll.u32 %s120_s8, 4  ;;  %s384_s17 = sshll.u32 %s566_s12, 8 }
  0x2a   : > { %s670_s19 = scalar_lea.hbm %s738_s0, %s384_s17  ;;  %s124_s18 = scalar_lea.vmem [#allocation2], %s370_s9 }
  0x2b   : > { %s131_s22 = sshll.u32 %s124_s18, 4  ;;  %p674_p7 = pnand %p425_p8, %p32_p9  ;;  %s672_s22 = int_to_ptr.vmem [resolvable:$true] %s131_s22 }
  0x2c   : > { %s678_s25 = scalar_lea.sflag [#allocation3], %s120_s8  ;;  %s498_s26 = scalar_lea.hbm %s670_s19, 256 }
  0x2d   : > { %p499_p10 = scmp.ne.s32.totalorder %s670_s19, %s498_s26  ;;  %p500_p11 = pneg %p674_p7 }
  0x2e   : > { %s503_s29 = scalar_lea.hbm %s738_s0, 512  ;;  %p504_p0 = scmp.lt.u32.totalorder %s670_s19, %s738_s0 }
  0x2f   : > { %p501_p12 = pnand %p500_p11, %p499_p10  ;;  %p505_p2 = scmp.lt.u32.totalorder %s503_s29, %s498_s26 }
  0x30   : > { %p507_p6 = scmp.lt.u32.totalorder %s498_s26, %s670_s19 }
  0x31   : > { %p502_p13 = pneg %p501_p12  ;;  %p506_p3 = por %p505_p2, %p504_p0 }
  0x33   : > { %p508_p1 = por %p507_p6, %p506_p3 }
  0x35   : > { %p509_p4 = pnand %p508_p1, %p502_p13 }
  0x37   : > { %512 = shalt.err (!%p509_p4)
}
  0x38   : > { %s513_s6 = scalar_lea.vmem %s672_s22, 256  ;;  %s571_s8 = smov [#allocation2]  }
  0x39   : > { %p514_p5 = scmp.ne.s32.totalorder %s672_s22, %s513_s6  ;;  %s518_s9 = sshll.u32 %s571_s8, 4  ;;  %s519_s9 = int_to_ptr.vmem [resolvable:$false] %s518_s9 }
  0x3a   : > { %s520_s17 = scalar_lea.vmem %s519_s9, 512  ;;  %p521_p10 = scmp.lt.s32.totalorder %s672_s22, %s519_s9 }
  0x3b   : > { %p516_p8 = pnand %p514_p5, %p500_p11  ;;  %p522_p12 = scmp.lt.s32.totalorder %s520_s17, %s513_s6 }
  0x3d   : > { %p517_p9 = pneg %p516_p8  ;;  %p523_p0 = por %p522_p12, %p521_p10 }
  0x3f   : > { %p524_p2 = pnand %p523_p0, %p517_p9 }
  0x41   : > { %527 = shalt.err (!%p524_p2)
}
  0x42   : > { %423 = dma.hbm_to_vmem [thread:$0]  (!%p674_p7), %s670_s19, 256, %s672_s22, %s678_s25, %s569_s3, %s569_s3, %s570_s4  }
  0x43   : > { %p750_p11 = scmp.ne.s32.totalorder %s747_s16, 0 }
  0x44   : > { %s145_s23 = sand.u32 (!%p750_p11), 1, %s558_s10   ;;  %p751_p13 = scmp.ne.s32.totalorder (!%p750_p11), %s746_s15, 0 }
  0x45   : > { %143 = sbr.rel (%p750_p11) target bundleno = 325 (0x145), region = 28  ;;  %s374_s24 = sshll.u32 (!%p750_p11), %s145_s23, 4 }
  0x46   : > { %s146_s18 = scalar_lea.sflag (!%p750_p11), [#allocation3], %s145_s23  ;;  %s149_s26 = scalar_lea.vmem (!%p750_p11), [#allocation2], %s374_s24 }
  0x4c   : > { %545 = dma.done.wait (%p751_p13), %s146_s18, 256  }
  0x4d   : > { %547 = vsyncadd (%p751_p13), %s146_s18, 4294967040  ;;  %p752_p3 = scmp.ne.s32.totalorder %s745_s14, 0 }
  0x4f   : > { %549 = dma.done.wait (%p752_p3), [#allocation5], 512  }
  0x50   : > { %551 = vsyncadd (%p752_p3), [#allocation5], 4294966784  ;;  %v195_v0 = vld [vmem:[#allocation4] sm:$0xff]  ;;  %v196_v1 = vld [vmem:[#allocation4 + $0x8] sm:$0xff]  ;;  %vm199_vm0 = vcmask 261120   ;;  %s376_s14 = sshll.u32 %s365_s13, 1  ;;  %v281_v16 = vlaneseq }
  0x51   : > { %v197_v2 = vld [vmem:[#allocation4 + $0x10] sm:$0xff]  ;;  %v402_v3 = vpack.c.bf16 %v196_v1, %v195_v0  ;;  %v198_v4 = vld [vmem:[#allocation4 + $0x18] sm:$0xff]  ;;  %p176_p7 = scmp.lt.s32.totalorder %s376_s14, 3 }
  0x52   : > { %v181_v5 = vld [vmem:[%s149_s26] sm:$0xff]  ;;  %v182_v6 = vld [vmem:[%s149_s26 + $0x8] sm:$0xff]  ;;  %v406_v7 = vpack.c.bf16 %v198_v4, %v197_v2  ;;  %v282_v17 = vand.u32 127, %v281_v16 }
  0x53   : > { %v378_v8 = vmul.f32 -1.442695, %v181_v5  ;;  %v379_v9 = vmul.f32 -1.442695, %v182_v6  ;;  %403 = vmatprep.subr.bf16.mxu0 %v402_v3  ;;  %s758_s14 = smov (!%p176_p7, %s376_s14), 3 }
  0x54   : > { %405 = vmatpush3.bf16.msra.mxu0 %v402_v3  ;;  %s377_s15 = sshll.u32 %s758_s14, 3  ;;  %vm283_vm1 = vcmp.lt.s32.totalorder %v282_v17, 8 }
  0x55   : > { %462 = vpow2.f32 %v378_v8  ;;  %407 = vmatprep.subr.bf16.mxu0 %v406_v7  ;;  %s179_s4 = scalar_lea.vmem %s740_s2, %s377_s15 }
  0x56   : > { %464 = vpow2.f32 %v379_v9 }
  0x58   : > { %409 = vmatpush3.bf16.msra.mxu0 %v406_v7 }
  0x5f   : > { %v463_v10 = vpop.eup %462 }
  0x60   : > { %v465_v11 = vpop.eup %464  ;;  %v189_v12 = vadd.f32 1.0, %v463_v10 }
  0x61   : > { %v190_v13 = vadd.f32 1.0, %v465_v11 }
  0x62   : > { %466 = vrcp.f32 %v189_v12 }
  0x63   : > { %468 = vrcp.f32 %v190_v13 }
  0x6c   : > { %v467_v14 = vpop.eup %466 }
  0x6d   : > { %v469_v15 = vpop.eup %468  ;;  %399 = vmatprep.mubr.msk.f32.mxu0 %vm199_vm0, %v467_v14 }
  0x6e   : > { %400 = vmatmul.mubr.msk.f32.vlgmr.msra.gmra.mrb[0].mxu0 %vm199_vm0, %v469_v15 }
 0x141   : > { %v401_v18 = vpop.f32.mrb[0].mxu0 }
 0x142   : > { %v272_v19 = vpop.f32.mrb[1].mxu0  ;;  %v285_v21 = vsel %vm283_vm1, %v401_v18, -1.0 }
 0x143   : > { %v284_v20 = vsel %vm283_vm1, %v272_v19, -1.0  ;;  %287 = vst [vmem:[%s179_s4 + $0x8] sm:$0xff] %v285_v21 }
 0x144   : > { %286 = vst [vmem:[%s179_s4] sm:$0xff] %v284_v20 }
 0x145 PF: > { %p13_p6 = scmp.ge.s32.totalorder %s634_s20, 4   ;;  %s753_s9 = smov %s558_s10 }
 0x146   : > { %s754_s10 = smov %s562_s11  ;;  %s755_s11 = smov %s663_s7 }
 0x147   : > { %s756_s12 = smov %s634_s20  ;;  %15 = sbr.rel (!%p13_p6) target bundleno = 4 (0x4), region = 72 }
 0x14e   :  { %310 = vsyncpa [#allocation3], 1 }
 0x14f   :  { %312 = vsyncpa [#allocation3 + $0x1], 1 }
 0x150   :  { %313 = vsyncpa [#allocation5], 1 }

</bundles_post_ra>
